<compile_context>
chip_gen: v7x
topology: tpu7x:2x2x1
jax: 0.10.0
libtpu: 0.0.40
codegen_flags: <defaults>
</compile_context>

<pallas_src>
import functools
import numpy as np

import jax
import jax.numpy as jnp
from jax.experimental import pallas as pl
from jax.experimental.pallas import tpu as pltpu


# ----------------------------- small math helpers (traced inside the kernel) ----

def _layernorm(x, eps=1e-6):
    mu = jnp.mean(x, axis=-1, keepdims=True)
    var = jnp.mean((x - mu) ** 2, axis=-1, keepdims=True)
    return (x - mu) * jax.lax.rsqrt(var + eps)


def _gelu_tanh(x):
    # GELU(approximate='tanh')
    return 0.5 * x * (1.0 + jnp.tanh(0.7978845608028654 * (x + 0.044715 * x * x * x)))


def _wht_axis0(x):
    """Unnormalized Walsh-Hadamard transform along axis 0 (size must be a power of 2).

    log2(N) butterfly stages (roll + sign-select) instead of a dense (N,N) matmul:
    no MXU flops and no (N,N) weight resident in VMEM. jnp.roll with a static shift
    lowers to two token-axis slices + a concat (safe everywhere).
    TODO(synk): use pltpu.roll (XLU sublane rotate) in the production flash-tiled kernel.
    """
    n = x.shape[0]
    row = jax.lax.broadcasted_iota(jnp.int32, x.shape, 0)
    h = 1
    while h < n:
        up = jnp.roll(x, -h, axis=0)     # up[r] = x[r + h]   (only read where bit == 0)
        dn = jnp.roll(x, h, axis=0)      # dn[r] = x[r - h]   (only read where bit == 1)
        low = (row & h) == 0
        x = jnp.where(low, x + up, dn - x)
        h *= 2
    return x


def _hadamard_matrix(n):
    # normalized Hadamard matrix H_n / sqrt(n); n must be a power of two
    assert n & (n - 1) == 0
    h = np.array([[1.0]], dtype=np.float64)
    while h.shape[0] < n:
        h = np.block([[h, h], [h, -h]])
    return jnp.asarray(h / np.sqrt(n), dtype=jnp.float32)


# ----------------------------------- the fused Pallas kernel --------------------

def dit_block_kernel(x_ref, mod_ref,
                     wqkv_ref, bqkv_ref,      # qkv proj (C -> 3C), bf16 W / f32 b (q pre-scaled)
                     wp_ref, bp_ref,          # out proj, per-head (H, hd, C) bf16 (1/sqrt(N) folded) / f32 b
                     w1_ref, b1_ref,          # mlp fc1, hC pre-folded: (C, Dm) bf16 / f32 b
                     w2_ref, b2_ref,          # mlp fc2, hM pre-folded: (Dm, C) bf16 / f32 b
                     o_ref, *, num_heads):
    N = x_ref.shape[1]
    C = x_ref.shape[2]
    H = num_heads
    hd = C // H
    bf16 = jnp.bfloat16

    x = x_ref[0]                    # (N, C) f32
    mod = mod_ref[0]                # (6, C) f32, precomputed adaLN modulation rows
    shift_msa, scale_msa, gate_msa = mod[0:1, :], mod[1:2, :], mod[2:3, :]
    shift_mlp, scale_mlp, gate_mlp = mod[3:4, :], mod[4:5, :], mod[5:6, :]

    # ---------------------------- attention branch ------------------------------
    h = _layernorm(x) * (1.0 + scale_msa) + shift_msa                      # modulate(norm1(x))
    qkv = jnp.dot(h.astype(bf16), wqkv_ref[...],
                  preferred_element_type=jnp.float32) + bqkv_ref[...]      # (N, 3C) f32

    # (H, N, hd) head-leading views (head-major columns inside each q/k/v block).
    # TODO(synk): at production shapes pad hd to a multiple of 128 and pre-permute the
    #             W_qkv columns so these lane slices are tile-aligned / relayout-free.
    def heads(base):
        return jnp.concatenate(
            [qkv[:, base + i * hd: base + (i + 1) * hd][None] for i in range(H)],
            axis=0).astype(bf16)

    q = heads(0 * C)                # attention scale already folded into W_q / b_q
    k = heads(1 * C)
    v = heads(2 * C)

    # batched scores over heads (single MXU contraction per head batch, no per-head loop)
    s = jnp.einsum('hnd,hmd->hnm', q, k, preferred_element_type=jnp.float32)   # (H, N, N)
    m = jnp.max(s, axis=-1, keepdims=True)
    e = jnp.exp(s - m)
    p = (e * pl.reciprocal(jnp.sum(e, axis=-1, keepdims=True), approx=True)).astype(bf16)
    o = jnp.einsum('hnm,hmd->hnd', p, v, preferred_element_type=jnp.float32)   # (H, N, hd)

    # head merge + out-proj fused: concat_h(o) @ Wp == sum_h o[h] @ Wp[h], accumulated
    # straight into a single (N, C) f32 value (no (H, N, C) intermediate slab).
    proj = jnp.dot(o[0].astype(bf16), wp_ref[0], preferred_element_type=jnp.float32)
    for i in range(1, H):
        proj = proj + jnp.dot(o[i].astype(bf16), wp_ref[i],
                              preferred_element_type=jnp.float32)

    # o_proj_hadamard acts on the token axis; it commutes with the channel-mixing proj and
    # its 1/sqrt(N) normalization is folded into Wp -> only the +/- butterfly runs here.
    attn = _wht_axis0(proj) + bp_ref[...]                                      # (N, C) f32

    x1 = x + gate_msa * attn

    # ------------------------------- MLP branch ---------------------------------
    # fc1_hadamard (hC) and the fc2 Hadamard (hM) are folded into w1/w2 in prepare_params()
    # (exact while the Quantizer is an identity passthrough).
    h2 = _layernorm(x1) * (1.0 + scale_mlp) + shift_mlp
    f = jnp.dot(h2.astype(bf16), w1_ref[...], preferred_element_type=jnp.float32) + b1_ref[...]
    f = _gelu_tanh(f)
    f = jnp.dot(f.astype(bf16), w2_ref[...], preferred_element_type=jnp.float32) + b2_ref[...]

    o_ref[0] = x1 + gate_mlp * f


# --------------------------- one-time weight preparation -------------------------

def prepare_params(params, num_heads):
    """Fold + cast weights once, outside the per-call path (review: don't redo per call)."""
    C = params["wqkv_t"].shape[0]
    N = params["hN"].shape[0]
    H = num_heads
    hd = C // H
    f32 = jnp.float32

    # attention scale folded into the q columns of the qkv projection
    scale = float(hd) ** (-0.5)
    wqkv = params["wqkv_t"].astype(f32).at[:, :C].multiply(scale)
    bqkv = params["bqkv"].astype(f32).at[:, :C].multiply(scale)

    # out-proj as per-head slabs; token-Hadamard normalization 1/sqrt(N) folded in
    wp = (params["wp_t"].astype(f32) / float(np.sqrt(N))).reshape(H, hd, C)

    # channel Hadamards folded into the MLP weights (exact: Quantizer == identity)
    w1_eff = params["hC"].astype(f32) @ params["w1_t"].astype(f32)     # (C, Dm)
    w2_eff = params["hM"].astype(f32) @ params["w2_t"].astype(f32)     # (Dm, C)

    return {
        "wm_t": params["wm_t"].astype(f32), "bm": params["bm"].astype(f32),
        "wqkv": wqkv.astype(jnp.bfloat16), "bqkv": bqkv,
        "wp": wp.astype(jnp.bfloat16), "bp": params["bp"].astype(f32),
        "w1": w1_eff.astype(jnp.bfloat16), "b1": params["b1"].astype(f32),
        "w2": w2_eff.astype(jnp.bfloat16), "b2": params["b2"].astype(f32),
    }


# ----------------------------------- wrapper ------------------------------------

@functools.partial(jax.jit, static_argnames=("num_heads",))
def flatten_dit_block(x, c, prep, num_heads):
    B, N, C = x.shape
    H = num_heads
    hd = C // H
    Dm = prep["w1"].shape[1]

    # adaLN_modulation hoisted out of the kernel (SiLU + tiny (B,C)@(C,6C) GEMV); only the
    # six (1,C) shift/scale/gate rows per batch element enter the kernel.
    c_silu = c * jax.nn.sigmoid(c)
    mod = (c_silu @ prep["wm_t"] + prep["bm"]).reshape(B, 6, C).astype(jnp.float32)

    def const_spec(shape):
        nd = len(shape)
        # TODO(synk): add pipeline_mode=pl.Buffered(1) at production sizes so constant
        #             weights are single-buffered (halves their resident VMEM footprint).
        return pl.BlockSpec(shape, lambda b, _nd=nd: (0,) * _nd)

    in_specs = [
        pl.BlockSpec((1, N, C), lambda b: (b, 0, 0)),     # x
        pl.BlockSpec((1, 6, C), lambda b: (b, 0, 0)),     # adaLN shift/scale/gate rows
        const_spec((C, 3 * C)), const_spec((1, 3 * C)),   # qkv
        const_spec((H, hd, C)), const_spec((1, C)),       # out proj (per-head) + bias
        const_spec((C, Dm)), const_spec((1, Dm)),         # fc1 (hC folded)
        const_spec((Dm, C)), const_spec((1, C)),          # fc2 (hM folded)
    ]

    # honest VMEM budget: double-buffered pipeline blocks + single-counted intermediates,
    # capped at ~85% of the queried physical VMEM (headroom for compiler scratch / sems).
    weight_bytes = sum(int(np.prod(prep[k].shape)) * prep[k].dtype.itemsize
                       for k in ("wqkv", "bqkv", "wp", "bp", "w1", "b1", "w2", "b2"))
    block_bytes = (N * C + 6 * C + N * C) * 4             # x / mod / out per-step f32 blocks
    interm_bytes = 4 * (3 * N * C                         # qkv
                        + 3 * H * N * hd                  # q, k, v
                        + 2 * H * N * N                   # scores + probs
                        + 6 * N * C                       # proj / attn / residual temporaries
                        + 2 * N * Dm)                     # mlp activations
    required = 2 * (weight_bytes + block_bytes) + interm_bytes
    try:
        vmem_cap = int(pltpu.get_tpu_info().vmem_capacity_bytes)
    except Exception:                                     # conservative: smallest chip (v7x)
        vmem_cap = 64 << 20
    vmem_limit = int(min(max(int(1.25 * required), 16 << 20), int(0.85 * vmem_cap)))

    kernel = functools.partial(dit_block_kernel, num_heads=num_heads)
    return pl.pallas_call(
        kernel,
        out_shape=jax.ShapeDtypeStruct((B, N, C), jnp.float32),
        grid=(B,),
        in_specs=in_specs,
        out_specs=pl.BlockSpec((1, N, C), lambda b: (b, 0, 0)),
        compiler_params=pltpu.CompilerParams(
            dimension_semantics=("parallel",),
            vmem_limit_bytes=vmem_limit),
    )(x, mod,
      prep["wqkv"], prep["bqkv"],
      prep["wp"], prep["bp"],
      prep["w1"], prep["b1"],
      prep["w2"], prep["b2"])


# ------------------------------ pure-JAX reference -------------------------------

def reference_block(x, c, params, num_heads):
    B, N, C = x.shape
    hd = C // num_heads
    c_silu = c * jax.nn.sigmoid(c)
    mod = c_silu @ params["wm_t"] + params["bm"]
    sm, scm, gm, sml, scml, gml = jnp.split(mod, 6, axis=1)

    h = _layernorm(x) * (1.0 + scm[:, None, :]) + sm[:, None, :]
    qkv = h @ params["wqkv_t"] + params["bqkv"]
    qkv = qkv.reshape(B, N, 3, num_heads, hd).transpose(2, 0, 3, 1, 4)
    q, k, v = qkv[0], qkv[1], qkv[2]
    a = jnp.einsum("bhnd,bhmd->bhnm", q, k) * (hd ** -0.5)
    a = jax.nn.softmax(a, axis=-1)
    attn = jnp.einsum("bhnm,bhmd->bhnd", a, v).transpose(0, 2, 1, 3).reshape(B, N, C)
    attn = jnp.einsum("nm,bmc->bnc", params["hN"], attn)
    attn = attn @ params["wp_t"] + params["bp"]
    x1 = x + gm[:, None, :] * attn

    h2 = _layernorm(x1) * (1.0 + scml[:, None, :]) + sml[:, None, :]
    h2 = h2 @ params["hC"]
    f = h2 @ params["w1_t"] + params["b1"]
    f = _gelu_tanh(f)
    f = f @ params["hM"]
    f = f @ params["w2_t"] + params["b2"]
    return x1 + gml[:, None, :] * f


# -------------------------------------- main -------------------------------------

if __name__ == "__main__":
    B, N, C, H = 2, 16, 32, 4
    Dm = int(C * 4.0)

    key = jax.random.PRNGKey(0)
    ks = jax.random.split(key, 12)

    def w(k, shape, scale=0.1):
        return (scale * jax.random.normal(k, shape)).astype(jnp.float32)

    params = {
        "wm_t":   w(ks[0], (C, 6 * C)),
        "bm":     w(ks[1], (1, 6 * C), 0.05),
        "wqkv_t": w(ks[2], (C, 3 * C)),
        "bqkv":   w(ks[3], (1, 3 * C), 0.05),
        "wp_t":   w(ks[4], (C, C)),
        "bp":     w(ks[5], (1, C), 0.05),
        "w1_t":   w(ks[6], (C, Dm)),
        "b1":     w(ks[7], (1, Dm), 0.05),
        "w2_t":   w(ks[8], (Dm, C)),
        "b2":     w(ks[9], (1, C), 0.05),
        "hN":     _hadamard_matrix(N),
        "hC":     _hadamard_matrix(C),
        "hM":     _hadamard_matrix(Dm),
    }

    x = jax.random.normal(ks[10], (B, N, C), dtype=jnp.float32)
    c = jax.random.normal(ks[11], (B, C), dtype=jnp.float32)

    prep = prepare_params(params, num_heads=H)

    out = flatten_dit_block(x, c, prep, num_heads=H)
    out = jax.block_until_ready(out)

    ref = reference_block(x, c, params, num_heads=H)
    assert out.shape == (B, N, C)
    # bf16 matmul operands + approx reciprocal -> relaxed tolerance vs. the f32 reference
    np.testing.assert_allclose(np.asarray(out), np.asarray(ref), rtol=5e-2, atol=5e-2)

    print("KERNEL_OK")
</pallas_src>

<mosaic_0001>
module attributes {stable_mosaic.version = 11 : i64} {
  func.func @dit_block_kernel(%arg0: i32, %arg1: memref<1x16x32xf32, #tpu.memory_space<vmem>>, %arg2: memref<1x6x32xf32, #tpu.memory_space<vmem>>, %arg3: memref<32x96xbf16, #tpu.memory_space<vmem>>, %arg4: memref<1x96xf32, #tpu.memory_space<vmem>>, %arg5: memref<4x8x32xbf16, #tpu.memory_space<vmem>>, %arg6: memref<1x32xf32, #tpu.memory_space<vmem>>, %arg7: memref<32x128xbf16, #tpu.memory_space<vmem>>, %arg8: memref<1x128xf32, #tpu.memory_space<vmem>>, %arg9: memref<128x32xbf16, #tpu.memory_space<vmem>>, %arg10: memref<1x32xf32, #tpu.memory_space<vmem>>, %arg11: memref<1x16x32xf32, #tpu.memory_space<vmem>>) attributes {dimension_semantics = [#tpu.dimension_semantics<parallel>], iteration_bounds = array<i64: 2>, scalar_prefetch = 0 : i64, scratch_operands = 0 : i64, tpu.core_type = #tpu.core_type<tc>, window_params = [{transform_indices = @transform_0, window_bounds = array<i64: 1, 16, 32>}, {transform_indices = @transform_1, window_bounds = array<i64: 1, 6, 32>}, {pipeline_mode = #tpu.pipeline_mode<synchronous>, transform_indices = @transform_2, window_bounds = array<i64: 32, 96>}, {pipeline_mode = #tpu.pipeline_mode<synchronous>, transform_indices = @transform_3, window_bounds = array<i64: 1, 96>}, {pipeline_mode = #tpu.pipeline_mode<synchronous>, transform_indices = @transform_4, window_bounds = array<i64: 4, 8, 32>}, {pipeline_mode = #tpu.pipeline_mode<synchronous>, transform_indices = @transform_5, window_bounds = array<i64: 1, 32>}, {pipeline_mode = #tpu.pipeline_mode<synchronous>, transform_indices = @transform_6, window_bounds = array<i64: 32, 128>}, {pipeline_mode = #tpu.pipeline_mode<synchronous>, transform_indices = @transform_7, window_bounds = array<i64: 1, 128>}, {pipeline_mode = #tpu.pipeline_mode<synchronous>, transform_indices = @transform_8, window_bounds = array<i64: 128, 32>}, {pipeline_mode = #tpu.pipeline_mode<synchronous>, transform_indices = @transform_9, window_bounds = array<i64: 1, 32>}, {transform_indices = @transform_10, window_bounds = array<i64: 1, 16, 32>}]} {
    %c0 = arith.constant 0 : index
    %c0_0 = arith.constant 0 : index
    %c0_1 = arith.constant 0 : index
    %0 = vector.load %arg1[%c0, %c0_0, %c0_1] : memref<1x16x32xf32, #tpu.memory_space<vmem>>, vector<1x16x32xf32>
    %1 = vector.shape_cast %0 : vector<1x16x32xf32> to vector<16x32xf32>
    %c0_2 = arith.constant 0 : index
    %c0_3 = arith.constant 0 : index
    %c0_4 = arith.constant 0 : index
    %2 = vector.load %arg2[%c0_2, %c0_3, %c0_4] : memref<1x6x32xf32, #tpu.memory_space<vmem>>, vector<1x6x32xf32>
    %3 = vector.shape_cast %2 : vector<1x6x32xf32> to vector<6x32xf32>
    %4 = vector.extract_strided_slice %3 {offsets = [0, 0], sizes = [1, 32], strides = [1, 1]} : vector<6x32xf32> to vector<1x32xf32>
    %5 = vector.extract_strided_slice %3 {offsets = [1, 0], sizes = [1, 32], strides = [1, 1]} : vector<6x32xf32> to vector<1x32xf32>
    %6 = vector.extract_strided_slice %3 {offsets = [2, 0], sizes = [1, 32], strides = [1, 1]} : vector<6x32xf32> to vector<1x32xf32>
    %7 = vector.extract_strided_slice %3 {offsets = [3, 0], sizes = [1, 32], strides = [1, 1]} : vector<6x32xf32> to vector<1x32xf32>
    %8 = vector.extract_strided_slice %3 {offsets = [4, 0], sizes = [1, 32], strides = [1, 1]} : vector<6x32xf32> to vector<1x32xf32>
    %9 = vector.extract_strided_slice %3 {offsets = [5, 0], sizes = [1, 32], strides = [1, 1]} : vector<6x32xf32> to vector<1x32xf32>
    %cst = arith.constant dense<0.000000e+00> : vector<16xf32>
    %10 = vector.multi_reduction <add>, %1, %cst [1] : vector<16x32xf32> to vector<16xf32>
    %11 = vector.shape_cast %10 : vector<16xf32> to vector<16x1xf32>
    %cst_5 = arith.constant 3.200000e+01 : f32
    %12 = vector.broadcast %cst_5 : f32 to vector<16x1xf32>
    %13 = arith.divf %11, %12 : vector<16x1xf32>
    %14 = vector.broadcast %13 : vector<16x1xf32> to vector<16x32xf32>
    %15 = arith.subf %1, %14 : vector<16x32xf32>
    %16 = arith.mulf %15, %15 : vector<16x32xf32>
    %cst_6 = arith.constant dense<0.000000e+00> : vector<16xf32>
    %17 = vector.multi_reduction <add>, %16, %cst_6 [1] : vector<16x32xf32> to vector<16xf32>
    %18 = vector.shape_cast %17 : vector<16xf32> to vector<16x1xf32>
    %cst_7 = arith.constant 3.200000e+01 : f32
    %19 = vector.broadcast %cst_7 : f32 to vector<16x1xf32>
    %20 = arith.divf %18, %19 : vector<16x1xf32>
    %21 = vector.broadcast %13 : vector<16x1xf32> to vector<16x32xf32>
    %22 = arith.subf %1, %21 : vector<16x32xf32>
    %cst_8 = arith.constant 9.99999997E-7 : f32
    %23 = vector.broadcast %cst_8 : f32 to vector<16x1xf32>
    %24 = arith.addf %20, %23 : vector<16x1xf32>
    %25 = math.rsqrt %24 : vector<16x1xf32>
    %26 = vector.broadcast %25 : vector<16x1xf32> to vector<16x32xf32>
    %27 = arith.mulf %22, %26 : vector<16x32xf32>
    %cst_9 = arith.constant 1.000000e+00 : f32
    %28 = vector.broadcast %cst_9 : f32 to vector<1x32xf32>
    %29 = arith.addf %28, %5 : vector<1x32xf32>
    %30 = vector.broadcast %29 : vector<1x32xf32> to vector<16x32xf32>
    %31 = arith.mulf %27, %30 : vector<16x32xf32>
    %32 = vector.broadcast %4 : vector<1x32xf32> to vector<16x32xf32>
    %33 = arith.addf %31, %32 : vector<16x32xf32>
    %34 = arith.truncf %33 : vector<16x32xf32> to vector<16x32xbf16>
    %c0_10 = arith.constant 0 : index
    %c0_11 = arith.constant 0 : index
    %35 = vector.load %arg3[%c0_10, %c0_11] : memref<32x96xbf16, #tpu.memory_space<vmem>>, vector<32x96xbf16>
    %cst_12 = arith.constant dense<0.000000e+00> : vector<16x96xf32>
    %36 = tpu.matmul %34, %35, %cst_12 {dimension_numbers = #tpu.dot_dimension_numbers<[1], [0], [0], [1], [0, 0, 1, 1], [], []>} : vector<16x32xbf16>, vector<32x96xbf16>, vector<16x96xf32> -> vector<16x96xf32>
    %c0_13 = arith.constant 0 : index
    %c0_14 = arith.constant 0 : index
    %37 = vector.load %arg4[%c0_13, %c0_14] : memref<1x96xf32, #tpu.memory_space<vmem>>, vector<1x96xf32>
    %38 = vector.broadcast %37 : vector<1x96xf32> to vector<16x96xf32>
    %39 = arith.addf %36, %38 : vector<16x96xf32>
    %40 = vector.extract_strided_slice %39 {offsets = [0, 0], sizes = [16, 8], strides = [1, 1]} : vector<16x96xf32> to vector<16x8xf32>
    %41 = vector.shape_cast %40 : vector<16x8xf32> to vector<1x16x8xf32>
    %42 = vector.extract_strided_slice %39 {offsets = [0, 8], sizes = [16, 8], strides = [1, 1]} : vector<16x96xf32> to vector<16x8xf32>
    %43 = vector.shape_cast %42 : vector<16x8xf32> to vector<1x16x8xf32>
    %44 = vector.extract_strided_slice %39 {offsets = [0, 16], sizes = [16, 8], strides = [1, 1]} : vector<16x96xf32> to vector<16x8xf32>
    %45 = vector.shape_cast %44 : vector<16x8xf32> to vector<1x16x8xf32>
    %46 = vector.extract_strided_slice %39 {offsets = [0, 24], sizes = [16, 8], strides = [1, 1]} : vector<16x96xf32> to vector<16x8xf32>
    %47 = vector.shape_cast %46 : vector<16x8xf32> to vector<1x16x8xf32>
    %48 = tpu.concatenate %41, %43, %45, %47 in 0 : vector<1x16x8xf32>, vector<1x16x8xf32>, vector<1x16x8xf32>, vector<1x16x8xf32> -> vector<4x16x8xf32>
    %49 = arith.truncf %48 : vector<4x16x8xf32> to vector<4x16x8xbf16>
    %50 = vector.extract_strided_slice %39 {offsets = [0, 32], sizes = [16, 8], strides = [1, 1]} : vector<16x96xf32> to vector<16x8xf32>
    %51 = vector.shape_cast %50 : vector<16x8xf32> to vector<1x16x8xf32>
    %52 = vector.extract_strided_slice %39 {offsets = [0, 40], sizes = [16, 8], strides = [1, 1]} : vector<16x96xf32> to vector<16x8xf32>
    %53 = vector.shape_cast %52 : vector<16x8xf32> to vector<1x16x8xf32>
    %54 = vector.extract_strided_slice %39 {offsets = [0, 48], sizes = [16, 8], strides = [1, 1]} : vector<16x96xf32> to vector<16x8xf32>
    %55 = vector.shape_cast %54 : vector<16x8xf32> to vector<1x16x8xf32>
    %56 = vector.extract_strided_slice %39 {offsets = [0, 56], sizes = [16, 8], strides = [1, 1]} : vector<16x96xf32> to vector<16x8xf32>
    %57 = vector.shape_cast %56 : vector<16x8xf32> to vector<1x16x8xf32>
    %58 = tpu.concatenate %51, %53, %55, %57 in 0 : vector<1x16x8xf32>, vector<1x16x8xf32>, vector<1x16x8xf32>, vector<1x16x8xf32> -> vector<4x16x8xf32>
    %59 = arith.truncf %58 : vector<4x16x8xf32> to vector<4x16x8xbf16>
    %60 = vector.extract_strided_slice %39 {offsets = [0, 64], sizes = [16, 8], strides = [1, 1]} : vector<16x96xf32> to vector<16x8xf32>
    %61 = vector.shape_cast %60 : vector<16x8xf32> to vector<1x16x8xf32>
    %62 = vector.extract_strided_slice %39 {offsets = [0, 72], sizes = [16, 8], strides = [1, 1]} : vector<16x96xf32> to vector<16x8xf32>
    %63 = vector.shape_cast %62 : vector<16x8xf32> to vector<1x16x8xf32>
    %64 = vector.extract_strided_slice %39 {offsets = [0, 80], sizes = [16, 8], strides = [1, 1]} : vector<16x96xf32> to vector<16x8xf32>
    %65 = vector.shape_cast %64 : vector<16x8xf32> to vector<1x16x8xf32>
    %66 = vector.extract_strided_slice %39 {offsets = [0, 88], sizes = [16, 8], strides = [1, 1]} : vector<16x96xf32> to vector<16x8xf32>
    %67 = vector.shape_cast %66 : vector<16x8xf32> to vector<1x16x8xf32>
    %68 = tpu.concatenate %61, %63, %65, %67 in 0 : vector<1x16x8xf32>, vector<1x16x8xf32>, vector<1x16x8xf32>, vector<1x16x8xf32> -> vector<4x16x8xf32>
    %69 = arith.truncf %68 : vector<4x16x8xf32> to vector<4x16x8xbf16>
    "tpu.trace_start"() <{level = 10 : i32, message = "hnd,hmd->hnm"}> : () -> ()
    %cst_15 = arith.constant dense<0.000000e+00> : vector<4x16x16xf32>
    %70 = tpu.matmul %49, %59, %cst_15 {dimension_numbers = #tpu.dot_dimension_numbers<[2], [2], [1], [1], [0, 0, 0, 1, 1, 1], [0], [0]>} : vector<4x16x8xbf16>, vector<4x16x8xbf16>, vector<4x16x16xf32> -> vector<4x16x16xf32>
    "tpu.trace_stop"() : () -> ()
    %cst_16 = arith.constant dense<0xFF800000> : vector<4x16xf32>
    %71 = vector.multi_reduction <maximumf>, %70, %cst_16 [2] : vector<4x16x16xf32> to vector<4x16xf32>
    %72 = vector.shape_cast %71 : vector<4x16xf32> to vector<4x16x1xf32>
    %73 = vector.broadcast %72 : vector<4x16x1xf32> to vector<4x16x16xf32>
    %74 = arith.subf %70, %73 : vector<4x16x16xf32>
    %75 = math.exp %74 : vector<4x16x16xf32>
    %cst_17 = arith.constant dense<0.000000e+00> : vector<4x16xf32>
    %76 = vector.multi_reduction <add>, %75, %cst_17 [2] : vector<4x16x16xf32> to vector<4x16xf32>
    %77 = vector.shape_cast %76 : vector<4x16xf32> to vector<4x16x1xf32>
    %78 = tpu.reciprocal %77 {approx = true} : vector<4x16x1xf32> -> vector<4x16x1xf32>
    %79 = vector.broadcast %78 : vector<4x16x1xf32> to vector<4x16x16xf32>
    %80 = arith.mulf %75, %79 : vector<4x16x16xf32>
    %81 = arith.truncf %80 : vector<4x16x16xf32> to vector<4x16x16xbf16>
    "tpu.trace_start"() <{level = 10 : i32, message = "hnm,hmd->hnd"}> : () -> ()
    %cst_18 = arith.constant dense<0.000000e+00> : vector<4x16x8xf32>
    %82 = tpu.matmul %81, %69, %cst_18 {dimension_numbers = #tpu.dot_dimension_numbers<[2], [1], [1], [2], [0, 0, 0, 1, 1, 2], [0], [0]>} : vector<4x16x16xbf16>, vector<4x16x8xbf16>, vector<4x16x8xf32> -> vector<4x16x8xf32>
    "tpu.trace_stop"() : () -> ()
    %83 = vector.extract_strided_slice %82 {offsets = [0, 0, 0], sizes = [1, 16, 8], strides = [1, 1, 1]} : vector<4x16x8xf32> to vector<1x16x8xf32>
    %84 = vector.shape_cast %83 : vector<1x16x8xf32> to vector<16x8xf32>
    %85 = arith.truncf %84 : vector<16x8xf32> to vector<16x8xbf16>
    %c0_19 = arith.constant 0 : index
    %c0_20 = arith.constant 0 : index
    %c0_21 = arith.constant 0 : index
    %86 = vector.load %arg5[%c0_19, %c0_20, %c0_21] : memref<4x8x32xbf16, #tpu.memory_space<vmem>>, vector<1x8x32xbf16>
    %87 = vector.shape_cast %86 : vector<1x8x32xbf16> to vector<8x32xbf16>
    %cst_22 = arith.constant dense<0.000000e+00> : vector<16x32xf32>
    %88 = tpu.matmul %85, %87, %cst_22 {dimension_numbers = #tpu.dot_dimension_numbers<[1], [0], [0], [1], [0, 0, 1, 1], [], []>} : vector<16x8xbf16>, vector<8x32xbf16>, vector<16x32xf32> -> vector<16x32xf32>
    %89 = vector.extract_strided_slice %82 {offsets = [1, 0, 0], sizes = [1, 16, 8], strides = [1, 1, 1]} : vector<4x16x8xf32> to vector<1x16x8xf32>
    %90 = vector.shape_cast %89 : vector<1x16x8xf32> to vector<16x8xf32>
    %91 = arith.truncf %90 : vector<16x8xf32> to vector<16x8xbf16>
    %c1 = arith.constant 1 : index
    %c0_23 = arith.constant 0 : index
    %c0_24 = arith.constant 0 : index
    %92 = vector.load %arg5[%c1, %c0_23, %c0_24] : memref<4x8x32xbf16, #tpu.memory_space<vmem>>, vector<1x8x32xbf16>
    %93 = vector.shape_cast %92 : vector<1x8x32xbf16> to vector<8x32xbf16>
    %cst_25 = arith.constant dense<0.000000e+00> : vector<16x32xf32>
    %94 = tpu.matmul %91, %93, %cst_25 {dimension_numbers = #tpu.dot_dimension_numbers<[1], [0], [0], [1], [0, 0, 1, 1], [], []>} : vector<16x8xbf16>, vector<8x32xbf16>, vector<16x32xf32> -> vector<16x32xf32>
    %95 = arith.addf %88, %94 : vector<16x32xf32>
    %96 = vector.extract_strided_slice %82 {offsets = [2, 0, 0], sizes = [1, 16, 8], strides = [1, 1, 1]} : vector<4x16x8xf32> to vector<1x16x8xf32>
    %97 = vector.shape_cast %96 : vector<1x16x8xf32> to vector<16x8xf32>
    %98 = arith.truncf %97 : vector<16x8xf32> to vector<16x8xbf16>
    %c2 = arith.constant 2 : index
    %c0_26 = arith.constant 0 : index
    %c0_27 = arith.constant 0 : index
    %99 = vector.load %arg5[%c2, %c0_26, %c0_27] : memref<4x8x32xbf16, #tpu.memory_space<vmem>>, vector<1x8x32xbf16>
    %100 = vector.shape_cast %99 : vector<1x8x32xbf16> to vector<8x32xbf16>
    %cst_28 = arith.constant dense<0.000000e+00> : vector<16x32xf32>
    %101 = tpu.matmul %98, %100, %cst_28 {dimension_numbers = #tpu.dot_dimension_numbers<[1], [0], [0], [1], [0, 0, 1, 1], [], []>} : vector<16x8xbf16>, vector<8x32xbf16>, vector<16x32xf32> -> vector<16x32xf32>
    %102 = arith.addf %95, %101 : vector<16x32xf32>
    %103 = vector.extract_strided_slice %82 {offsets = [3, 0, 0], sizes = [1, 16, 8], strides = [1, 1, 1]} : vector<4x16x8xf32> to vector<1x16x8xf32>
    %104 = vector.shape_cast %103 : vector<1x16x8xf32> to vector<16x8xf32>
    %105 = arith.truncf %104 : vector<16x8xf32> to vector<16x8xbf16>
    %c3 = arith.constant 3 : index
    %c0_29 = arith.constant 0 : index
    %c0_30 = arith.constant 0 : index
    %106 = vector.load %arg5[%c3, %c0_29, %c0_30] : memref<4x8x32xbf16, #tpu.memory_space<vmem>>, vector<1x8x32xbf16>
    %107 = vector.shape_cast %106 : vector<1x8x32xbf16> to vector<8x32xbf16>
    %cst_31 = arith.constant dense<0.000000e+00> : vector<16x32xf32>
    %108 = tpu.matmul %105, %107, %cst_31 {dimension_numbers = #tpu.dot_dimension_numbers<[1], [0], [0], [1], [0, 0, 1, 1], [], []>} : vector<16x8xbf16>, vector<8x32xbf16>, vector<16x32xf32> -> vector<16x32xf32>
    %109 = arith.addf %102, %108 : vector<16x32xf32>
    %110 = tpu.iota {dimensions = array<i32: 0>} : vector<16x32xi32>
    %111 = vector.extract_strided_slice %109 {offsets = [1, 0], sizes = [15, 32], strides = [1, 1]} : vector<16x32xf32> to vector<15x32xf32>
    %112 = vector.extract_strided_slice %109 {offsets = [0, 0], sizes = [1, 32], strides = [1, 1]} : vector<16x32xf32> to vector<1x32xf32>
    %113 = tpu.concatenate %111, %112 in 0 : vector<15x32xf32>, vector<1x32xf32> -> vector<16x32xf32>
    %114 = vector.extract_strided_slice %109 {offsets = [15, 0], sizes = [1, 32], strides = [1, 1]} : vector<16x32xf32> to vector<1x32xf32>
    %115 = vector.extract_strided_slice %109 {offsets = [0, 0], sizes = [15, 32], strides = [1, 1]} : vector<16x32xf32> to vector<15x32xf32>
    %116 = tpu.concatenate %114, %115 in 0 : vector<1x32xf32>, vector<15x32xf32> -> vector<16x32xf32>
    %c1_i32 = arith.constant 1 : i32
    %117 = vector.broadcast %c1_i32 : i32 to vector<16x32xi32>
    %118 = arith.andi %110, %117 : vector<16x32xi32>
    %c0_i32 = arith.constant 0 : i32
    %119 = vector.broadcast %c0_i32 : i32 to vector<16x32xi32>
    %120 = arith.cmpi eq, %118, %119 : vector<16x32xi32>
    %121 = arith.addf %109, %113 : vector<16x32xf32>
    %122 = arith.subf %116, %109 : vector<16x32xf32>
    %123 = arith.select %120, %121, %122 : vector<16x32xi1>, vector<16x32xf32>
    %124 = vector.extract_strided_slice %123 {offsets = [2, 0], sizes = [14, 32], strides = [1, 1]} : vector<16x32xf32> to vector<14x32xf32>
    %125 = vector.extract_strided_slice %123 {offsets = [0, 0], sizes = [2, 32], strides = [1, 1]} : vector<16x32xf32> to vector<2x32xf32>
    %126 = tpu.concatenate %124, %125 in 0 : vector<14x32xf32>, vector<2x32xf32> -> vector<16x32xf32>
    %127 = vector.extract_strided_slice %123 {offsets = [14, 0], sizes = [2, 32], strides = [1, 1]} : vector<16x32xf32> to vector<2x32xf32>
    %128 = vector.extract_strided_slice %123 {offsets = [0, 0], sizes = [14, 32], strides = [1, 1]} : vector<16x32xf32> to vector<14x32xf32>
    %129 = tpu.concatenate %127, %128 in 0 : vector<2x32xf32>, vector<14x32xf32> -> vector<16x32xf32>
    %c2_i32 = arith.constant 2 : i32
    %130 = vector.broadcast %c2_i32 : i32 to vector<16x32xi32>
    %131 = arith.andi %110, %130 : vector<16x32xi32>
    %c0_i32_32 = arith.constant 0 : i32
    %132 = vector.broadcast %c0_i32_32 : i32 to vector<16x32xi32>
    %133 = arith.cmpi eq, %131, %132 : vector<16x32xi32>
    %134 = arith.addf %123, %126 : vector<16x32xf32>
    %135 = arith.subf %129, %123 : vector<16x32xf32>
    %136 = arith.select %133, %134, %135 : vector<16x32xi1>, vector<16x32xf32>
    %137 = vector.extract_strided_slice %136 {offsets = [4, 0], sizes = [12, 32], strides = [1, 1]} : vector<16x32xf32> to vector<12x32xf32>
    %138 = vector.extract_strided_slice %136 {offsets = [0, 0], sizes = [4, 32], strides = [1, 1]} : vector<16x32xf32> to vector<4x32xf32>
    %139 = tpu.concatenate %137, %138 in 0 : vector<12x32xf32>, vector<4x32xf32> -> vector<16x32xf32>
    %140 = vector.extract_strided_slice %136 {offsets = [12, 0], sizes = [4, 32], strides = [1, 1]} : vector<16x32xf32> to vector<4x32xf32>
    %141 = vector.extract_strided_slice %136 {offsets = [0, 0], sizes = [12, 32], strides = [1, 1]} : vector<16x32xf32> to vector<12x32xf32>
    %142 = tpu.concatenate %140, %141 in 0 : vector<4x32xf32>, vector<12x32xf32> -> vector<16x32xf32>
    %c4_i32 = arith.constant 4 : i32
    %143 = vector.broadcast %c4_i32 : i32 to vector<16x32xi32>
    %144 = arith.andi %110, %143 : vector<16x32xi32>
    %c0_i32_33 = arith.constant 0 : i32
    %145 = vector.broadcast %c0_i32_33 : i32 to vector<16x32xi32>
    %146 = arith.cmpi eq, %144, %145 : vector<16x32xi32>
    %147 = arith.addf %136, %139 : vector<16x32xf32>
    %148 = arith.subf %142, %136 : vector<16x32xf32>
    %149 = arith.select %146, %147, %148 : vector<16x32xi1>, vector<16x32xf32>
    %150 = vector.extract_strided_slice %149 {offsets = [8, 0], sizes = [8, 32], strides = [1, 1]} : vector<16x32xf32> to vector<8x32xf32>
    %151 = vector.extract_strided_slice %149 {offsets = [0, 0], sizes = [8, 32], strides = [1, 1]} : vector<16x32xf32> to vector<8x32xf32>
    %152 = tpu.concatenate %150, %151 in 0 : vector<8x32xf32>, vector<8x32xf32> -> vector<16x32xf32>
    %153 = vector.extract_strided_slice %149 {offsets = [8, 0], sizes = [8, 32], strides = [1, 1]} : vector<16x32xf32> to vector<8x32xf32>
    %154 = vector.extract_strided_slice %149 {offsets = [0, 0], sizes = [8, 32], strides = [1, 1]} : vector<16x32xf32> to vector<8x32xf32>
    %155 = tpu.concatenate %153, %154 in 0 : vector<8x32xf32>, vector<8x32xf32> -> vector<16x32xf32>
    %c8_i32 = arith.constant 8 : i32
    %156 = vector.broadcast %c8_i32 : i32 to vector<16x32xi32>
    %157 = arith.andi %110, %156 : vector<16x32xi32>
    %c0_i32_34 = arith.constant 0 : i32
    %158 = vector.broadcast %c0_i32_34 : i32 to vector<16x32xi32>
    %159 = arith.cmpi eq, %157, %158 : vector<16x32xi32>
    %160 = arith.addf %149, %152 : vector<16x32xf32>
    %161 = arith.subf %155, %149 : vector<16x32xf32>
    %162 = arith.select %159, %160, %161 : vector<16x32xi1>, vector<16x32xf32>
    %c0_35 = arith.constant 0 : index
    %c0_36 = arith.constant 0 : index
    %163 = vector.load %arg6[%c0_35, %c0_36] : memref<1x32xf32, #tpu.memory_space<vmem>>, vector<1x32xf32>
    %164 = vector.broadcast %163 : vector<1x32xf32> to vector<16x32xf32>
    %165 = arith.addf %162, %164 : vector<16x32xf32>
    %166 = vector.broadcast %6 : vector<1x32xf32> to vector<16x32xf32>
    %167 = arith.mulf %166, %165 : vector<16x32xf32>
    %168 = arith.addf %1, %167 : vector<16x32xf32>
    %cst_37 = arith.constant dense<0.000000e+00> : vector<16xf32>
    %169 = vector.multi_reduction <add>, %168, %cst_37 [1] : vector<16x32xf32> to vector<16xf32>
    %170 = vector.shape_cast %169 : vector<16xf32> to vector<16x1xf32>
    %cst_38 = arith.constant 3.200000e+01 : f32
    %171 = vector.broadcast %cst_38 : f32 to vector<16x1xf32>
    %172 = arith.divf %170, %171 : vector<16x1xf32>
    %173 = vector.broadcast %172 : vector<16x1xf32> to vector<16x32xf32>
    %174 = arith.subf %168, %173 : vector<16x32xf32>
    %175 = arith.mulf %174, %174 : vector<16x32xf32>
    %cst_39 = arith.constant dense<0.000000e+00> : vector<16xf32>
    %176 = vector.multi_reduction <add>, %175, %cst_39 [1] : vector<16x32xf32> to vector<16xf32>
    %177 = vector.shape_cast %176 : vector<16xf32> to vector<16x1xf32>
    %cst_40 = arith.constant 3.200000e+01 : f32
    %178 = vector.broadcast %cst_40 : f32 to vector<16x1xf32>
    %179 = arith.divf %177, %178 : vector<16x1xf32>
    %180 = vector.broadcast %172 : vector<16x1xf32> to vector<16x32xf32>
    %181 = arith.subf %168, %180 : vector<16x32xf32>
    %cst_41 = arith.constant 9.99999997E-7 : f32
    %182 = vector.broadcast %cst_41 : f32 to vector<16x1xf32>
    %183 = arith.addf %179, %182 : vector<16x1xf32>
    %184 = math.rsqrt %183 : vector<16x1xf32>
    %185 = vector.broadcast %184 : vector<16x1xf32> to vector<16x32xf32>
    %186 = arith.mulf %181, %185 : vector<16x32xf32>
    %cst_42 = arith.constant 1.000000e+00 : f32
    %187 = vector.broadcast %cst_42 : f32 to vector<1x32xf32>
    %188 = arith.addf %187, %8 : vector<1x32xf32>
    %189 = vector.broadcast %188 : vector<1x32xf32> to vector<16x32xf32>
    %190 = arith.mulf %186, %189 : vector<16x32xf32>
    %191 = vector.broadcast %7 : vector<1x32xf32> to vector<16x32xf32>
    %192 = arith.addf %190, %191 : vector<16x32xf32>
    %193 = arith.truncf %192 : vector<16x32xf32> to vector<16x32xbf16>
    %c0_43 = arith.constant 0 : index
    %c0_44 = arith.constant 0 : index
    %194 = vector.load %arg7[%c0_43, %c0_44] : memref<32x128xbf16, #tpu.memory_space<vmem>>, vector<32x128xbf16>
    %cst_45 = arith.constant dense<0.000000e+00> : vector<16x128xf32>
    %195 = tpu.matmul %193, %194, %cst_45 {dimension_numbers = #tpu.dot_dimension_numbers<[1], [0], [0], [1], [0, 0, 1, 1], [], []>} : vector<16x32xbf16>, vector<32x128xbf16>, vector<16x128xf32> -> vector<16x128xf32>
    %c0_46 = arith.constant 0 : index
    %c0_47 = arith.constant 0 : index
    %196 = vector.load %arg8[%c0_46, %c0_47] : memref<1x128xf32, #tpu.memory_space<vmem>>, vector<1x128xf32>
    %197 = vector.broadcast %196 : vector<1x128xf32> to vector<16x128xf32>
    %198 = arith.addf %195, %197 : vector<16x128xf32>
    %cst_48 = arith.constant 5.000000e-01 : f32
    %199 = vector.broadcast %cst_48 : f32 to vector<16x128xf32>
    %200 = arith.mulf %199, %198 : vector<16x128xf32>
    %cst_49 = arith.constant 4.471500e-02 : f32
    %201 = vector.broadcast %cst_49 : f32 to vector<16x128xf32>
    %202 = arith.mulf %201, %198 : vector<16x128xf32>
    %203 = arith.mulf %202, %198 : vector<16x128xf32>
    %204 = arith.mulf %203, %198 : vector<16x128xf32>
    %205 = arith.addf %198, %204 : vector<16x128xf32>
    %cst_50 = arith.constant 0.797884583 : f32
    %206 = vector.broadcast %cst_50 : f32 to vector<16x128xf32>
    %207 = arith.mulf %206, %205 : vector<16x128xf32>
    %208 = math.tanh %207 : vector<16x128xf32>
    %cst_51 = arith.constant 1.000000e+00 : f32
    %209 = vector.broadcast %cst_51 : f32 to vector<16x128xf32>
    %210 = arith.addf %209, %208 : vector<16x128xf32>
    %211 = arith.mulf %200, %210 : vector<16x128xf32>
    %212 = arith.truncf %211 : vector<16x128xf32> to vector<16x128xbf16>
    %c0_52 = arith.constant 0 : index
    %c0_53 = arith.constant 0 : index
    %213 = vector.load %arg9[%c0_52, %c0_53] : memref<128x32xbf16, #tpu.memory_space<vmem>>, vector<128x32xbf16>
    %cst_54 = arith.constant dense<0.000000e+00> : vector<16x32xf32>
    %214 = tpu.matmul %212, %213, %cst_54 {dimension_numbers = #tpu.dot_dimension_numbers<[1], [0], [0], [1], [0, 0, 1, 1], [], []>} : vector<16x128xbf16>, vector<128x32xbf16>, vector<16x32xf32> -> vector<16x32xf32>
    %c0_55 = arith.constant 0 : index
    %c0_56 = arith.constant 0 : index
    %215 = vector.load %arg10[%c0_55, %c0_56] : memref<1x32xf32, #tpu.memory_space<vmem>>, vector<1x32xf32>
    %216 = vector.broadcast %215 : vector<1x32xf32> to vector<16x32xf32>
    %217 = arith.addf %214, %216 : vector<16x32xf32>
    %218 = vector.broadcast %9 : vector<1x32xf32> to vector<16x32xf32>
    %219 = arith.mulf %218, %217 : vector<16x32xf32>
    %220 = arith.addf %168, %219 : vector<16x32xf32>
    %c0_57 = arith.constant 0 : index
    %c0_58 = arith.constant 0 : index
    %c0_59 = arith.constant 0 : index
    %221 = vector.load %arg11[%c0_57, %c0_58, %c0_59] : memref<1x16x32xf32, #tpu.memory_space<vmem>>, vector<1x16x32xf32>
    %222 = vector.shape_cast %221 : vector<1x16x32xf32> to vector<16x32xf32>
    %223 = vector.shape_cast %220 : vector<16x32xf32> to vector<1x16x32xf32>
    tpu.vector_store %arg11[%c0_57, %c0_58, %c0_59], %223 {strides = array<i32>} : memref<1x16x32xf32, #tpu.memory_space<vmem>>, vector<1x16x32xf32>,
    return
  }
  func.func @transform_0(%arg0: i32) -> (i32, i32, i32) {
    %c0_i32 = arith.constant 0 : i32
    %c0_i32_0 = arith.constant 0 : i32
    %c0_i32_1 = arith.constant 0 : i32
    return %arg0, %c0_i32, %c0_i32_0 : i32, i32, i32
  }
  func.func @transform_1(%arg0: i32) -> (i32, i32, i32) {
    %c0_i32 = arith.constant 0 : i32
    %c0_i32_0 = arith.constant 0 : i32
    %c0_i32_1 = arith.constant 0 : i32
    return %arg0, %c0_i32, %c0_i32_0 : i32, i32, i32
  }
  func.func @transform_2(%arg0: i32) -> (i32, i32) {
    %c0_i32 = arith.constant 0 : i32
    %c0_i32_0 = arith.constant 0 : i32
    %c0_i32_1 = arith.constant 0 : i32
    return %c0_i32, %c0_i32_0 : i32, i32
  }
  func.func @transform_3(%arg0: i32) -> (i32, i32) {
    %c0_i32 = arith.constant 0 : i32
    %c0_i32_0 = arith.constant 0 : i32
    %c0_i32_1 = arith.constant 0 : i32
    return %c0_i32, %c0_i32_0 : i32, i32
  }
  func.func @transform_4(%arg0: i32) -> (i32, i32, i32) {
    %c0_i32 = arith.constant 0 : i32
    %c0_i32_0 = arith.constant 0 : i32
    %c0_i32_1 = arith.constant 0 : i32
    %c0_i32_2 = arith.constant 0 : i32
    return %c0_i32, %c0_i32_0, %c0_i32_1 : i32, i32, i32
  }
  func.func @transform_5(%arg0: i32) -> (i32, i32) {
    %c0_i32 = arith.constant 0 : i32
    %c0_i32_0 = arith.constant 0 : i32
    %c0_i32_1 = arith.constant 0 : i32
    return %c0_i32, %c0_i32_0 : i32, i32
  }
  func.func @transform_6(%arg0: i32) -> (i32, i32) {
    %c0_i32 = arith.constant 0 : i32
    %c0_i32_0 = arith.constant 0 : i32
    %c0_i32_1 = arith.constant 0 : i32
    return %c0_i32, %c0_i32_0 : i32, i32
  }
  func.func @transform_7(%arg0: i32) -> (i32, i32) {
    %c0_i32 = arith.constant 0 : i32
    %c0_i32_0 = arith.constant 0 : i32
    %c0_i32_1 = arith.constant 0 : i32
    return %c0_i32, %c0_i32_0 : i32, i32
  }
  func.func @transform_8(%arg0: i32) -> (i32, i32) {
    %c0_i32 = arith.constant 0 : i32
    %c0_i32_0 = arith.constant 0 : i32
    %c0_i32_1 = arith.constant 0 : i32
    return %c0_i32, %c0_i32_0 : i32, i32
  }
  func.func @transform_9(%arg0: i32) -> (i32, i32) {
    %c0_i32 = arith.constant 0 : i32
    %c0_i32_0 = arith.constant 0 : i32
    %c0_i32_1 = arith.constant 0 : i32
    return %c0_i32, %c0_i32_0 : i32, i32
  }
  func.func @transform_10(%arg0: i32) -> (i32, i32, i32) {
    %c0_i32 = arith.constant 0 : i32
    %c0_i32_0 = arith.constant 0 : i32
    %c0_i32_1 = arith.constant 0 : i32
    return %arg0, %c0_i32, %c0_i32_0 : i32, i32, i32
  }
}

</mosaic_0001>

<bundles_post_ra>
// kernel: flatten_dit_block.1
= control target key start
LH: loop header
LB: loop body
LE: loop exit
PB: predicated region body
PF: predicated region fallthrough
CT: control target
= control target key end

     0   :  { %15 = vsyncpa [#allocation3], 0  ;;  %s2437_s0 = inlined_call_operand.vmem [shape: f32[2,16,32], index: 0, kind: input, shape index: {}]   ;;  %s2438_s1 = inlined_call_operand.vmem [shape: f32[2,6,32], index: 1, kind: input, shape index: {}]   ;;  %s2439_s2 = inlined_call_operand.vmem [shape: bf16[32,96], index: 2, kind: input, shape index: {}]   ;;  %s2440_s3 = inlined_call_operand.vmem [shape: f32[1,96], index: 3, kind: input, shape index: {}]   ;;  %s2441_s4 = inlined_call_operand.vmem [shape: bf16[4,8,32], index: 4, kind: input, shape index: {}]   ;;  %s2442_s5 = inlined_call_operand.vmem [shape: f32[1,32], index: 5, kind: input, shape index: {}]   ;;  %s2443_s6 = inlined_call_operand.vmem [shape: bf16[32,128], index: 6, kind: input, shape index: {}]   ;;  %s2444_s7 = inlined_call_operand.vmem [shape: f32[1,128], index: 7, kind: input, shape index: {}]   ;;  %s2445_s8 = inlined_call_operand.vmem [shape: bf16[128,32], index: 8, kind: input, shape index: {}]   ;;  %s2446_s9 = inlined_call_operand.vmem [shape: f32[1,32], index: 9, kind: input, shape index: {}]   ;;  %s2447_s10 = inlined_call_operand.hbm [shape: f32[2,16,32], index: 10, kind: output, shape index: {}]  }
   0x1   :  { %17 = vsyncpa [#allocation3 + $0x1], 0  ;;  %s2092_s13 = smov 0   ;;  %s2094_s14 = smov 0  }
   0x2   :  { %s2096_s15 = smov 0   ;;  %s2098_s16 = smov 0  }
   0x3 LB: > { %s2113_s17 = sadd.s32 4294967295, %s2025_s16   ;;  %s1637_s18 = sadd.s32 4294967294, %s2025_s16   ;;  %s2025_s16 = sphi %s2098_s16, %s2453_s16   ;;  %s2021_s15 = sphi %s2096_s15, %s2452_s15   ;;  %s2017_s14 = sphi %s2094_s14, %s2451_s14   ;;  %s2013_s13 = sphi %s2092_s13, %s2450_s13  }
   0x4   : > { %s2117_s19 = sadd.s32 1, %s2025_s16   ;;  %s250_s20 = sadd.s32 1, %s2021_s15 }
   0x5   : > { %s247_s21 = ssub.s32 %s2025_s16, %s2117_s19  ;;  %p260_p0 = scmp.ne.s32.totalorder %s2021_s15, %s2017_s14 }
   0x6   : > { %p248_p1 = scmp.eq.s32.totalorder %s247_s21, 0  ;;  %p261_p2 = scmp.eq.s32.totalorder %s2113_s17, 1 }
   0x7   : > { %p266_p3 = scmp.ne.s32.totalorder %s2017_s14, %s2013_s13  ;;  %p267_p4 = scmp.eq.s32.totalorder %s1637_s18, 1 }
   0x8   : > { %s2128_s22 = scalar_select %p248_p1, %s2021_s15, %s250_s20  }
   0x9   : > { %p2130_p5 = por %p261_p2, %p260_p0  ;;  %p2134_p6 = por %p267_p4, %p266_p3 }
   0xa   : > { %p1640_p7 = scmp.ge.s32.totalorder %s2025_s16, 1  ;;  %p324_p8 = scmp.lt.s32.totalorder %s2025_s16, 3 }
   0xc   : > { %p325_p9 = pnand %p1640_p7, %p324_p8 }
   0xd   : > { %p366_p10 = scmp.lt.s32.totalorder (!%p325_p9), %s2113_s17, 1  ;;  %vm379_vm0 = vcmask (!%p325_p9), 261120   ;;  %v1907_v14 = vld [vmem:[%s2439_s2] sm:$0xff] (!%p325_p9)   ;;  %v2027_v15 = vmov (!%p325_p9), 0.0   ;;  %v1908_v16 = vld [vmem:[%s2439_s2 + $0x8] sm:$0xff] (!%p325_p9)   ;;  %vm2028_vm1 = vmmov (!%p325_p9), 0   ;;  %v408_v20 = vlaneseq (!%p325_p9) }
   0xe   : > { %328 = sbr.rel (%p325_p9) target bundleno = 2658 (0xa62), region = 60  ;;  %1724 = vmatprep.subr.bf16.mxu1 (!%p325_p9), %v2027_v15  ;;  %1738 = vmatprep.subr.bf16.mxu0 (!%p325_p9), %v2027_v15  ;;  %v1645_v40 = vld [vmem:[%s2440_s3] ss:$0 sm:$0xff] (!%p325_p9)  ;;  %s2030_s30 = smov (!%p325_p9), 120   ;;  %vm515_vm2 = vcmask (!%p325_p9), 64512   ;;  %vm713_vm3 = vcmask (!%p325_p9), 130048  }
   0xf   : > { %1725 = vmatpush3.bf16.msra.mxu1 (!%p325_p9), %v1907_v14  ;;  %1728 = vmatprep.mubr.msk.bf16.mxu1 (!%p325_p9), %vm2028_vm1, %v2027_v15  ;;  %v2178_v24 = vshrl.u32 (!%p325_p9), %v408_v20, 7  ;;  %s2031_s11 = smov (!%p325_p9), 104   ;;  %s2032_s12 = smov (!%p325_p9), 96   ;;  %vm1002_vm4 = vcmask (!%p325_p9), 1043456   ;;  %vm1203_vm5 = vcmask (!%p325_p9), 1046528   ;;  %vm1213_vm6 = vcmask (!%p325_p9), 1040384  }
  0x10   : > { %1726 = vmatprep.subr.bf16.mxu1 (!%p325_p9), %v2027_v15  ;;  %1740 = vmatprep.mubr.msk.bf16.mxu0 (!%p325_p9), %vm2028_vm1, %v2027_v15  ;;  %s2033_s18 = smov (!%p325_p9), 64   ;;  %vm1231_vm9 = vcmask (!%p325_p9), 1045504   ;;  %vm1241_vm10 = vcmask (!%p325_p9), 1041408  }
  0x11   : > { %v410_v27 = vsub.s32 (!%p325_p9), 1, %v2178_v24  ;;  %v416_v31 = vsub.s32 (!%p325_p9), 0, %v2178_v24 }
  0x13   : > { %1727 = vmatpush3.bf16.msra.mxu1 (!%p325_p9), %v1908_v16 }
  0x14   : > { %1732 = vmatprep.subr.bf16.mxu1 (!%p325_p9), %v2027_v15 }
  0x15   : > { %s2142_s25 = scalar_select %p366_p10, %s2113_s17, 1 }
  0x17   : > { %s1683_s26 = sshll.u32 %s2142_s25, 4  ;;  %s1644_s20 = sshll.u32 %s2142_s25, 3 }
  0x18   : > { %s370_s29 = scalar_lea.vmem %s2437_s0, %s1683_s26  ;;  %s374_s27 = scalar_lea.vmem %s2438_s1, %s1644_s20 }
  0x19   : > { %v2148_v0 = vld [vmem:[%s370_s29] sm:$0xff]  ;;  %v2150_v1 = vld [vmem:[%s370_s29 + $0x8] sm:$0xff]  ;;  %s2029_s29 = smov 112  }
  0x1a   : > { %v380_v2 = vsel %vm379_vm0, %v2148_v0, 0.0  ;;  %v383_v3 = vsel %vm379_vm0, %v2150_v1, 0.0  ;;  %v2180_v25 = vld [vmem:[%s374_s27] sm:$0x3f]  ;;  %s1684_s27 = sshll.u32 %s2113_s17, 8 }
  0x1b   : > { %381 = vadd.xlane.f32.xlu0 %v380_v2  ;;  %v2183_v26 = vadd.f32 1.0, %v2180_v25  ;;  %v417_v35 = vrot.slane %v2180_v25, %v416_v31 }
  0x1d   : > { %v411_v30 = vrot.slane %v2183_v26, %v410_v27 }
  0x1f   : > { %384 = vadd.xlane.f32.xlu0 %v383_v3 }
  0xa8   : > { %v382_v4 = vpop.xlane.xlu0 %381 }
  0xa9   : > { %v387_v5 = vmul.f32 0.03125, %v382_v4 }
  0xab   : > { %v389_v6 = vsub.f32 %v2148_v0, %v387_v5 }
  0xac   : > { %v385_v7 = vpop.xlane.xlu0 %384 }
  0xad   : > { %v388_v8 = vmul.f32 0.03125, %v385_v7  ;;  %v391_v9 = vmul.f32 %v389_v6, %v389_v6 }
  0xaf   : > { %v390_v10 = vsub.f32 %v2150_v1, %v388_v8  ;;  %v393_v11 = vsel %vm379_vm0, %v391_v9, 0.0 }
  0xb0   : > { %394 = vadd.xlane.f32.xlu1 %v393_v11 }
  0xb1   : > { %v392_v12 = vmul.f32 %v390_v10, %v390_v10 }
  0xb3   : > { %v396_v13 = vsel %vm379_vm0, %v392_v12, 0.0 }
  0xb4   : > { %397 = vadd.xlane.f32.xlu1 %v396_v13 }
 0x13d   : > { %v395_v17 = vpop.xlane.xlu1 %394 }
 0x13e   : > { %v399_v18 = vmul.f32 0.03125, %v395_v17 }
 0x140   : > { %v401_v19 = vadd.f32 1e-06, %v399_v18 }
 0x141   : > { %v398_v21 = vpop.xlane.xlu1 %397 }
 0x142   : > { %1919 = vrsqrt.f32 %v401_v19  ;;  %v400_v22 = vmul.f32 0.03125, %v398_v21 }
 0x144   : > { %v402_v23 = vadd.f32 1e-06, %v400_v22 }
 0x146   : > { %1921 = vrsqrt.f32 %v402_v23 }
 0x14c   : > { %v1920_v28 = vpop.eup %1919 }
 0x14d   : > { %v405_v29 = vmul.f32 %v1920_v28, %v389_v6 }
 0x14f   : > { %v412_v34 = vmul.f32 %v411_v30, %v405_v29 }
 0x150   : > { %v1922_v32 = vpop.eup %1921 }
 0x151   : > { %v406_v33 = vmul.f32 %v1922_v32, %v390_v10  ;;  %v418_v37 = vadd.f32 %v417_v35, %v412_v34 }
 0x153   : > { %v413_v36 = vmul.f32 %v411_v30, %v406_v33 }
 0x155   : > { %v419_v38 = vadd.f32 %v417_v35, %v413_v36 }
 0x157   : > { %v420_v39 = vpack.c.bf16 %v419_v38, %v418_v37 }
 0x159   : > { %1729 = vmatmul.mubr.msk.bf16.vlgmr.msra.gmra.mrb[0].mxu1 %vm379_vm0, %v420_v39 }
 0x15a   : > { %1734 = vmatprep.mubr.msk.bf16.mxu1 %vm2028_vm1, %v2027_v15 }
 0x22c   : > { %v481_v41 = vpop.f32.mrb[0].mxu1 }
 0x22d   : > { %v1730_v42 = vpop.f32.mrb[1].mxu1  ;;  %v482_v44 = vadd.f32 %v1645_v40, %v481_v41 }
 0x22e   : > { %v484_v43 = vpop.f32.mrb[2].mxu1 }
 0x22f   : > { %v485_v45 = vadd.f32 %v1645_v40, %v484_v43  ;;  %v1731_v46 = vpop.f32.mrb[3].mxu1 }
 0x231   : > { %v1897_v47 = vpack.i.bf16 %v485_v45, %v482_v44  ;;  %v2195_v48 = vpack.c.bf16 %v485_v45, %v482_v44 }
 0x233   : > { %1898 = vrot.lane.b32.xlu1 %v1897_v47, %s2029_s29  ;;  %1893 = vrot.lane.b32.xlu0 %v1897_v47, %s2030_s30 }
 0x237   : > { %1903 = vrot.lane.b32.xlu1 %v1897_v47, %s2031_s11  ;;  %513 = vrot.lane.b32.xlu0 %v2195_v48, %s2032_s12  ;;  %s2389_s11 = scalar_lea.hbm %s2447_s10, %s1684_s27 }
 0x2a5   : > { %v1899_v49 = vpop.permute.xlu1 %1898  ;;  %v1894_v50 = vpop.permute.xlu0 %1893 }
 0x2a6   : > { %v1896_v51 = vunpack.i.h.bf16 %v1894_v50  ;;  %v1895_v52 = vunpack.i.l.bf16 %v1894_v50  ;;  %v1901_v53 = vunpack.i.h.bf16 %v1899_v49  ;;  %v1900_v54 = vunpack.i.l.bf16 %v1899_v49 }
 0x2a8   : > { %v2198_v55 = vpack.c.bf16 %v1896_v51, %v1895_v52  ;;  %v2202_v61 = vpack.c.bf16 %v1901_v53, %v1900_v54 }
 0x2a9   : > { %v1904_v56 = vpop.permute.xlu1 %1903  ;;  %v514_v57 = vpop.permute.xlu0 %513 }
 0x2aa   : > { %v1906_v58 = vunpack.i.h.bf16 %v1904_v56  ;;  %v1905_v59 = vunpack.i.l.bf16 %v1904_v56  ;;  %v520_v60 = vsel %vm515_vm2, %v514_v57, 0  ;;  %564 = vrot.lane.b32.xlu1 %v2198_v55, %s2032_s12 }
 0x2ab   : > { %1733 = vmatpush3.bf16.xpose.msra.mxu1 %v520_v60 }
 0x2ac   : > { %v2204_v62 = vpack.c.bf16 %v1906_v58, %v1905_v59  ;;  %1744 = vmatprep.subr.bf16.mxu1 %v2027_v15 }
 0x2ae   : > { %614 = vrot.lane.b32.xlu1 %v2202_v61, %s2032_s12  ;;  %664 = vrot.lane.b32.xlu0 %v2204_v62, %s2032_s12 }
 0x2b2   : > { %1735 = vmatmul.mubr.msk.bf16.vlgmr.msra.gmra.mrb[4].mxu1 %vm515_vm2, %v2195_v48 }
 0x2b3   : > { %1746 = vmatprep.mubr.msk.bf16.mxu1 %vm2028_vm1, %v2027_v15 }
 0x31c   : > { %v565_v63 = vpop.permute.xlu1 %564 }
 0x31d   : > { %v570_v2 = vsel %vm515_vm2, %v565_v63, 0 }
 0x31e   : > { %1739 = vmatpush3.bf16.xpose.msra.mxu0 %v570_v2 }
 0x31f   : > { %1750 = vmatprep.subr.bf16.mxu0 %v2027_v15 }
 0x320   : > { %v615_v3 = vpop.permute.xlu1 %614  ;;  %v665_v5 = vpop.permute.xlu0 %664 }
 0x321   : > { %v620_v4 = vsel %vm515_vm2, %v615_v3, 0  ;;  %v670_v6 = vsel %vm515_vm2, %v665_v5, 0 }
 0x322   : > { %1745 = vmatpush3.bf16.xpose.msra.mxu1 %v620_v4 }
 0x323   : > { %1756 = vmatprep.subr.bf16.mxu1 %v2027_v15 }
 0x325   : > { %1741 = vmatmul.mubr.msk.bf16.vlgmr.msra.gmra.mrb[0].mxu0 %vm515_vm2, %v2198_v55 }
 0x326   : > { %1751 = vmatpush3.bf16.xpose.msra.mxu0 %v670_v6  ;;  %1752 = vmatprep.mubr.msk.bf16.mxu0 %vm2028_vm1, %v2027_v15 }
 0x327   : > { %1762 = vmatprep.subr.bf16.mxu0 %v2027_v15 }
 0x329   : > { %1747 = vmatmul.mubr.msk.bf16.vlgmr.msra.gmra.mrb[8].mxu1 %vm515_vm2, %v2202_v61 }
 0x32a   : > { %1758 = vmatprep.mubr.msk.bf16.mxu1 %vm2028_vm1, %v2027_v15 }
 0x32d   : > { %1753 = vmatmul.mubr.msk.bf16.vlgmr.msra.gmra.mrb[4].mxu0 %vm515_vm2, %v2204_v62 }
 0x32e   : > { %1764 = vmatprep.mubr.msk.bf16.mxu0 %vm2028_vm1, %v2027_v15 }
 0x385   : > { %v556_v7 = vpop.f32.mrb[4].mxu1 }
 0x386   : > { %v1736_v8 = vpop.f32.mrb[5].mxu1  ;;  %v714_v23 = vsel %vm713_vm3, %v556_v7, -inf }
 0x387   : > { %v559_v9 = vpop.f32.mrb[6].mxu1 }
 0x388   : > { %v1737_v10 = vpop.f32.mrb[7].mxu1  ;;  %v717_v32 = vsel %vm713_vm3, %v559_v9, -inf }
 0x3f8   : > { %v606_v11 = vpop.f32.mrb[0].mxu0 }
 0x3f9   : > { %v1742_v12 = vpop.f32.mrb[1].mxu0  ;;  %v720_v13 = vsel %vm713_vm3, %v606_v11, -inf }
 0x3fa   : > { %721 = vmax.xlane.f32.xlu1 %v720_v13  ;;  %v609_v14 = vpop.f32.mrb[2].mxu0 }
 0x3fb   : > { %v1743_v16 = vpop.f32.mrb[3].mxu0  ;;  %v723_v17 = vsel %vm713_vm3, %v609_v14, -inf }
 0x3fc   : > { %724 = vmax.xlane.f32.xlu0 %v723_v17  ;;  %v2233_v18 = vpop.f32.mrb[8].mxu1 }
 0x3fd   : > { %v1748_v19 = vpop.f32.mrb[9].mxu1  ;;  %v726_v20 = vsel %vm713_vm3, %v2233_v18, -inf }
 0x3fe   : > { %727 = vmax.xlane.f32.xlu1 %v726_v20  ;;  %v659_v21 = vpop.f32.mrb[10].mxu1 }
 0x3ff   : > { %v1749_v22 = vpop.f32.mrb[11].mxu1  ;;  %v729_v33 = vsel %vm713_vm3, %v659_v21, -inf }
 0x400   : > { %v706_v27 = vpop.f32.mrb[4].mxu0  ;;  %715 = vmax.xlane.f32.xlu0 %v714_v23 }
 0x401   : > { %v1754_v28 = vpop.f32.mrb[5].mxu0  ;;  %v732_v29 = vsel %vm713_vm3, %v706_v27, -inf }
 0x402   : > { %v709_v30 = vpop.f32.mrb[6].mxu0  ;;  %733 = vmax.xlane.f32.xlu1 %v732_v29 }
 0x403   : > { %v1755_v31 = vpop.f32.mrb[7].mxu0  ;;  %v735_v34 = vsel %vm713_vm3, %v709_v30, -inf }
 0x404   : > { %718 = vmax.xlane.f32.xlu0 %v717_v32 }
 0x408   : > { %730 = vmax.xlane.f32.xlu0 %v729_v33 }
 0x40c   : > { %736 = vmax.xlane.f32.xlu0 %v735_v34 }
 0x487   : > { %v722_v35 = vpop.xlane.xlu1 %721 }
 0x488   : > { %v740_v37 = vsub.f32 %v606_v11, %v722_v35 }
 0x489   : > { %v725_v36 = vpop.xlane.xlu0 %724 }
 0x48a   : > { %v750_v41 = vmul.f32 1.442695, %v740_v37  ;;  %v741_v42 = vsub.f32 %v609_v14, %v725_v36 }
 0x48b   : > { %v728_v40 = vpop.xlane.xlu1 %727 }
 0x48c   : > { %v752_v46 = vmul.f32 1.442695, %v741_v42  ;;  %v742_v13 = vsub.f32 %v2233_v18, %v728_v40 }
 0x48d   : > { %v716_v38 = vpop.xlane.xlu0 %715 }
 0x48e   : > { %v738_v39 = vsub.f32 %v556_v7, %v716_v38  ;;  %v754_v14 = vmul.f32 1.442695, %v742_v13  ;;  %v1662_v13 = vld [vmem:[%s2441_s4 + $0xc] sm:$0xf] }
 0x48f   : > { %v734_v49 = vpop.xlane.xlu1 %733 }
 0x490   : > { %v746_v43 = vmul.f32 1.442695, %v738_v39  ;;  %v744_v52 = vsub.f32 %v706_v27, %v734_v49 }
 0x491   : > { %v719_v44 = vpop.xlane.xlu0 %718 }
 0x492   : > { %1923 = vpow2.f32 %v746_v43  ;;  %v739_v45 = vsub.f32 %v559_v9, %v719_v44  ;;  %v758_v57 = vmul.f32 1.442695, %v744_v52 }
 0x493   : > { %1925 = vpow2.f32 %v750_v41 }
 0x494   : > { %v748_v47 = vmul.f32 1.442695, %v739_v45 }
 0x495   : > { %v731_v50 = vpop.xlane.xlu0 %730 }
 0x496   : > { %1927 = vpow2.f32 %v748_v47  ;;  %v743_v51 = vsub.f32 %v659_v21, %v731_v50  ;;  %v1657_v50 = vld [vmem:[%s2441_s4 + $0x4] sm:$0xf] }
 0x497   : > { %1929 = vpow2.f32 %v752_v46 }
 0x498   : > { %v756_v53 = vmul.f32 1.442695, %v743_v51  ;;  %v1004_v51 = vsel %vm1002_vm4, %v1657_v50, 0 }
 0x499   : > { %v737_v54 = vpop.xlane.xlu0 %736 }
 0x49a   : > { %1931 = vpow2.f32 %v756_v53  ;;  %v745_v58 = vsub.f32 %v709_v30, %v737_v54  ;;  %v995_v53 = vld [vmem:[%s2441_s4] sm:$0xf] }
 0x49b   : > { %1933 = vpow2.f32 %v758_v57 }
 0x49c   : > { %v1924_v56 = vpop.eup %1923  ;;  %v760_v2 = vmul.f32 1.442695, %v745_v58 }
 0x49d   : > { %v762_v59 = vsel %vm713_vm3, %v1924_v56, 0.0  ;;  %v1926_v60 = vpop.eup %1925 }
 0x49e   : > { %763 = vadd.xlane.f32.xlu1 %v762_v59  ;;  %v768_v3 = vsel %vm713_vm3, %v1926_v60, 0.0  ;;  %1935 = vpow2.f32 %v760_v2  ;;  %v1051_v59 = vsel %vm1002_vm4, %v995_v53, 0 }
 0x49f   : > { %1937 = vpow2.f32 %v754_v14 }
 0x4a0   : > { %v1928_v63 = vpop.eup %1927 }
 0x4a1   : > { %v765_v4 = vsel %vm713_vm3, %v1928_v63, 0.0  ;;  %v1930_v5 = vpop.eup %1929 }
 0x4a2   : > { %769 = vadd.xlane.f32.xlu1 %v768_v3  ;;  %766 = vadd.xlane.f32.xlu0 %v765_v4  ;;  %v771_v6 = vsel %vm713_vm3, %v1930_v5, 0.0 }
 0x4a4   : > { %v2246_v7 = vpop.eup %1931 }
 0x4a5   : > { %v777_v8 = vsel %vm713_vm3, %v2246_v7, 0.0  ;;  %v1934_v9 = vpop.eup %1933 }
 0x4a6   : > { %772 = vadd.xlane.f32.xlu0 %v771_v6  ;;  %v780_v10 = vsel %vm713_vm3, %v1934_v9, 0.0 }
 0x4a8   : > { %v1936_v11 = vpop.eup %1935 }
 0x4a9   : > { %v783_v12 = vsel %vm713_vm3, %v1936_v11, 0.0  ;;  %v1938_v16 = vpop.eup %1937 }
 0x4aa   : > { %778 = vadd.xlane.f32.xlu0 %v777_v8  ;;  %v774_v17 = vsel %vm713_vm3, %v1938_v16, 0.0 }
 0x4ae   : > { %781 = vadd.xlane.f32.xlu0 %v780_v10 }
 0x4b2   : > { %784 = vadd.xlane.f32.xlu0 %v783_v12 }
 0x4b3   : > { %853 = vrot.lane.b32.xlu1 %v2198_v55, %s2033_s18 }
 0x4c8   : > { %806 = vrot.lane.b32.xlu0 %v2195_v48, %s2033_s18 }
 0x4d7   : > { %775 = vadd.xlane.f32.xlu1 %v774_v17 }
 0x4e8   : > { %900 = vrot.lane.b32.xlu1 %v2202_v61, %s2033_s18 }
 0x4ec   : > { %947 = vrot.lane.b32.xlu1 %v2204_v62, %s2033_s18  ;;  %s363_s18 = sand.u32 1, %s2017_s14  }
 0x4ed   : > { %s1641_s20 = sshll.u32 %s363_s18, 4  ;;  %s2396_s17 = scalar_lea.sflag [#allocation3], %s363_s18 }
 0x4ee   : > { %s365_s25 = scalar_lea.vmem [#allocation2], %s1641_s20  ;;  %s2034_s20 = smov [#allocation2]  }
 0x4ef   : > { %s1563_s28 = sshll.u32 %s365_s25, 4  ;;  %s1967_s21 = sshll.u32 %s2034_s20, 4  ;;  %s2391_s28 = int_to_ptr.vmem [resolvable:$true] %s1563_s28  ;;  %s1968_s21 = int_to_ptr.vmem [resolvable:$false] %s1967_s21 }
 0x4f0   : > { %s1963_s12 = scalar_lea.vmem %s2391_s28, 256  ;;  %s1969_s26 = scalar_lea.vmem %s1968_s21, 512 }
 0x4f1   : > { %p1964_p11 = scmp.ne.s32.totalorder %s2391_s28, %s1963_s12  ;;  %p1970_p0 = scmp.lt.s32.totalorder %s2391_s28, %s1968_s21 }
 0x4f2   : > { %p1971_p1 = scmp.lt.s32.totalorder %s1969_s26, %s1963_s12 }
 0x4f3   : > { %p1965_p12 = pnand %p1964_p11, %p2130_p5 }
 0x4f4   : > { %p1972_p2 = por %p1971_p1, %p1970_p0 }
 0x4f5   : > { %p1966_p13 = pneg %p1965_p12 }
 0x4f7   : > { %p1973_p3 = pnand %p1972_p2, %p1966_p13 }
 0x52b   : > { %v764_v19 = vpop.xlane.xlu1 %763 }
 0x52f   : > { %v770_v20 = vpop.xlane.xlu1 %769  ;;  %v767_v21 = vpop.xlane.xlu0 %766 }
 0x530   : > { %1939 = vrcp.f32 %v770_v20  ;;  %v1153_v20 = vsel %vm1002_vm4, %v1662_v13, 0 }
 0x531   : > { %1941 = vrcp.f32 %v767_v21  ;;  %v1200_v21 = vadd.s32 8, %v2178_v24 }
 0x533   : > { %v854_v55 = vpop.permute.xlu1 %853  ;;  %v773_v22 = vpop.xlane.xlu0 %772 }
 0x534   : > { %1943 = vrcp.f32 %v773_v22  ;;  %1763 = vmatpush3.bf16.msra.mxu0 %v854_v55  ;;  %v1219_v22 = vand.u32 1, %v2178_v24 }
 0x535   : > { %1774 = vmatprep.subr.bf16.mxu0 %v2027_v15  ;;  %1945 = vrcp.f32 %v764_v19 }
 0x536   : > { %vm1221_vm7 = vcmp.eq.s32.totalorder %v1219_v22, 0 }
 0x537   : > { %v779_v48 = vpop.xlane.xlu0 %778 }
 0x53a   : > { %v1940_v23 = vpop.eup %1939 }
 0x53b   : > { %v782_v18 = vpop.xlane.xlu0 %781  ;;  %v1942_v27 = vpop.eup %1941  ;;  %v796_v61 = vmul.f32 %v1940_v23, %v1926_v60 }
 0x53c   : > { %v795_v31 = vmul.f32 %v1942_v27, %v1928_v63 }
 0x53e   : > { %v1944_v28 = vpop.eup %1943 }
 0x53f   : > { %v797_v29 = vmul.f32 %v1944_v28, %v1930_v5  ;;  %v785_v62 = vpop.xlane.xlu0 %784  ;;  %v1946_v30 = vpop.eup %1945  ;;  %v1660_v5 = vld [vmem:[%s2441_s4 + $0x8] sm:$0xf] }
 0x540   : > { %v794_v33 = vmul.f32 %v1946_v30, %v1924_v56  ;;  %1947 = vrcp.f32 %v785_v62  ;;  %v1101_v6 = vsel %vm1002_vm4, %v1660_v5, 0  ;;  %v1247_v30 = vand.u32 2, %v2178_v24 }
 0x541   : > { %v803_v32 = vpack.c.bf16 %v797_v29, %v796_v61  ;;  %1949 = vrcp.f32 %v782_v18 }
 0x542   : > { %v802_v35 = vpack.c.bf16 %v795_v31, %v794_v33  ;;  %1951 = vrcp.f32 %v779_v48  ;;  %v1220_v48 = vand.u32 1, %v1200_v21  ;;  %v1248_v31 = vand.u32 2, %v1200_v21 }
 0x543   : > { %1765 = vmatmul.mubr.msk.bf16.vlgmr.msra.gmra.mrb[8].mxu0 %vm713_vm3, %v803_v32  ;;  %v807_v34 = vpop.permute.xlu0 %806  ;;  %vm1249_vm11 = vcmp.eq.s32.totalorder %v1247_v30, 0 }
 0x544   : > { %1757 = vmatpush3.bf16.msra.mxu1 %v807_v34  ;;  %1776 = vmatprep.mubr.msk.bf16.mxu0 %vm2028_vm1, %v2027_v15  ;;  %vm1222_vm8 = vcmp.eq.s32.totalorder %v1220_v48, 0  ;;  %vm1250_vm12 = vcmp.eq.s32.totalorder %v1248_v31, 0  ;;  %v1909_v31 = vld [vmem:[%s2443_s6] sm:$0xff]  }
 0x545   : > { %1768 = vmatprep.subr.bf16.mxu1 %v2027_v15 }
 0x547   : > { %1759 = vmatmul.mubr.msk.bf16.vlgmr.msra.gmra.mrb[12].mxu1 %vm713_vm3, %v802_v35 }
 0x548   : > { %1770 = vmatprep.mubr.msk.bf16.mxu1 %vm2028_vm1, %v2027_v15 }
 0x54a   : > { %v1948_v37 = vpop.eup %1947 }
 0x54b   : > { %v1950_v39 = vpop.eup %1949  ;;  %v801_v40 = vmul.f32 %v1948_v37, %v1936_v11 }
 0x54c   : > { %v800_v41 = vmul.f32 %v1950_v39, %v1934_v9  ;;  %v1952_v43 = vpop.eup %1951 }
 0x54d   : > { %v799_v46 = vmul.f32 %v1952_v43, %v2246_v7 }
 0x54e   : > { %v805_v44 = vpack.c.bf16 %v801_v40, %v800_v41 }
 0x564   : > { %v776_v36 = vpop.xlane.xlu1 %775 }
 0x565   : > { %1953 = vrcp.f32 %v776_v36 }
 0x568   : > { %v901_v38 = vpop.permute.xlu1 %900 }
 0x569   : > { %1769 = vmatpush3.bf16.msra.mxu1 %v901_v38 }
 0x56a   : > { %1780 = vmatprep.subr.bf16.mxu1 %v2027_v15 }
 0x56c   : > { %v948_v42 = vpop.permute.xlu1 %947 }
 0x56d   : > { %1775 = vmatpush3.bf16.msra.mxu0 %v948_v42 }
 0x56e   : > { %1804 = vmatprep.subr.bf16.mxu0 %v2027_v15 }
 0x56f   : > { %v1954_v45 = vpop.eup %1953 }
 0x570   : > { %v798_v47 = vmul.f32 %v1954_v45, %v1938_v16  ;;  %1777 = vmatmul.mubr.msk.bf16.vlgmr.msra.gmra.mrb[12].mxu0 %vm713_vm3, %v805_v44 }
 0x571   : > { %1808 = vmatprep.mubr.msk.bf16.mxu0 %vm2028_vm1, %v2027_v15  ;;  %1805 = vmatpush3.bf16.msra.mxu0 %v1909_v31 }
 0x572   : > { %v804_v49 = vpack.c.bf16 %v799_v46, %v798_v47  ;;  %v1266_v46 = vand.u32 4, %v2178_v24  ;;  %1806 = vmatprep.subr.bf16.mxu0 %v2027_v15 }
 0x574   : > { %1771 = vmatmul.mubr.msk.bf16.vlgmr.msra.gmra.mrb[16].mxu1 %vm713_vm3, %v804_v49  ;;  %vm1268_vm13 = vcmp.eq.s32.totalorder %v1266_v46, 0 }
 0x575   : > { %1782 = vmatprep.mubr.msk.bf16.mxu1 %vm2028_vm1, %v2027_v15  ;;  %1781 = vmatpush3.bf16.msra.mxu1 %v1004_v51 }
 0x576   : > { %1786 = vmatprep.subr.bf16.mxu1 %v2027_v15 }
 0x616   : > { %v893_v52 = vpop.f32.mrb[8].mxu0 }
 0x617   : > { %v1766_v54 = vpop.f32.mrb[9].mxu0 }
 0x618   : > { %v896_v56 = vpop.f32.mrb[10].mxu0 }
 0x619   : > { %v996_v57 = vpack.c.bf16 %v896_v56, %v893_v52  ;;  %v1767_v58 = vpop.f32.mrb[11].mxu0 }
 0x61a   : > { %v846_v60 = vpop.f32.mrb[12].mxu1 }
 0x61b   : > { %v1760_v63 = vpop.f32.mrb[13].mxu1  ;;  %1783 = vmatmul.mubr.msk.bf16.vlgmr.msra.gmra.mrb[20].mxu1 %vm515_vm2, %v996_v57  ;;  %v1267_v57 = vand.u32 4, %v1200_v21 }
 0x61c   : > { %v849_v2 = vpop.f32.mrb[14].mxu1  ;;  %1787 = vmatpush3.bf16.msra.mxu1 %v1051_v59  ;;  %1788 = vmatprep.mubr.msk.bf16.mxu1 %vm2028_vm1, %v2027_v15 }
 0x61d   : > { %v994_v3 = vpack.c.bf16 %v849_v2, %v846_v60  ;;  %v1761_v4 = vpop.f32.mrb[15].mxu1  ;;  %1792 = vmatprep.subr.bf16.mxu1 %v2027_v15  ;;  %vm1269_vm14 = vcmp.eq.s32.totalorder %v1267_v57, 0  ;;  %v1915_v57 = vld [vmem:[%s2445_s8 + $0x20] sm:$0xff]  }
 0x61e   : > { %v1296_v4 = vsub.s32 2, %v2178_v24 }
 0x620   : > { %v1297_v13 = vrot.slane %v2180_v25, %v1296_v4 }
 0x627   : > { %1789 = vmatmul.mubr.msk.bf16.vlgmr.msra.gmra.mrb[20].mxu1 %vm515_vm2, %v994_v3 }
 0x628   : > { %1793 = vmatpush3.bf16.msra.mxu1 %v1101_v6  ;;  %1794 = vmatprep.mubr.msk.bf16.mxu1 %vm2028_vm1, %v2027_v15 }
 0x629   : > { %1798 = vmatprep.subr.bf16.mxu1 %v2027_v15 }
 0x643   : > { %v987_v7 = vpop.f32.mrb[12].mxu0 }
 0x644   : > { %v1778_v8 = vpop.f32.mrb[13].mxu0 }
 0x645   : > { %v990_v9 = vpop.f32.mrb[14].mxu0 }
 0x646   : > { %v1146_v10 = vpack.c.bf16 %v990_v9, %v987_v7  ;;  %v1779_v11 = vpop.f32.mrb[15].mxu0 }
 0x647   : > { %v940_v12 = vpop.f32.mrb[16].mxu1  ;;  %v1664_v11 = vld [vmem:[%s2442_s5] ss:$0 sm:$0xff] }
 0x648   : > { %v1772_v14 = vpop.f32.mrb[17].mxu1 }
 0x649   : > { %v943_v16 = vpop.f32.mrb[18].mxu1 }
 0x64a   : > { %v1094_v17 = vpack.c.bf16 %v943_v16, %v940_v12  ;;  %v1773_v19 = vpop.f32.mrb[19].mxu1 }
 0x64c   : > { %1795 = vmatmul.mubr.msk.bf16.vlgmr.msra.gmra.mrb[20].mxu1 %vm515_vm2, %v1094_v17 }
 0x64d   : > { %1799 = vmatpush3.bf16.msra.mxu1 %v1153_v20  ;;  %1800 = vmatprep.mubr.msk.bf16.mxu1 %vm2028_vm1, %v2027_v15 }
 0x658   : > { %1801 = vmatmul.mubr.msk.bf16.vlgmr.msra.gmra.mrb[20].mxu1 %vm515_vm2, %v1146_v10 }
 0x72b   : > { %v1189_v55 = vpop.f32.mrb[20].mxu1 }
 0x72c   : > { %v1802_v18 = vpop.f32.mrb[21].mxu1  ;;  %v1204_v27 = vrot.slane %v1189_v55, 1  ;;  %v1214_v28 = vrot.slane %v1189_v55, 7 }
 0x72d   : > { %v1192_v23 = vpop.f32.mrb[22].mxu1 }
 0x72e   : > { %v1205_v61 = vrot.slane %v1192_v23, 1  ;;  %v1211_v29 = vrot.slane %v1192_v23, 7  ;;  %v1803_v62 = vpop.f32.mrb[23].mxu1 }
 0x730   : > { %v1206_v32 = vsel %vm1203_vm5, %v1204_v27, %v1205_v61  ;;  %v1210_v33 = vsel %vm1203_vm5, %v1205_v61, %v1204_v27  ;;  %v1215_v34 = vsel %vm1213_vm6, %v1214_v28, %v1211_v29  ;;  %v1218_v35 = vsel %vm1213_vm6, %v1211_v29, %v1214_v28 }
 0x731   : > { %v1223_v36 = vadd.f32 %v1206_v32, %v1189_v55  ;;  %v1224_v37 = vadd.f32 %v1210_v33, %v1192_v23  ;;  %v1225_v38 = vsub.f32 %v1218_v35, %v1189_v55  ;;  %v1226_v39 = vsub.f32 %v1215_v34, %v1192_v23  ;;  %v1910_v32 = vld [vmem:[%s2443_s6 + $0x8] sm:$0xff]  }
 0x732   : > { %1807 = vmatpush3.bf16.msra.mxu0 %v1910_v32 }
 0x733   : > { %v1227_v40 = vsel %vm1221_vm7, %v1223_v36, %v1225_v38  ;;  %v1228_v41 = vsel %vm1222_vm8, %v1224_v37, %v1226_v39  ;;  %1812 = vmatprep.subr.bf16.mxu0 %v2027_v15  ;;  %v1330_v39 = vsub.s32 4, %v2178_v24 }
 0x734   : > { %v1232_v42 = vrot.slane %v1227_v40, 2  ;;  %v1233_v43 = vrot.slane %v1228_v41, 2  ;;  %v1239_v44 = vrot.slane %v1228_v41, 6  ;;  %v1242_v45 = vrot.slane %v1227_v40, 6 }
 0x736   : > { %v1234_v47 = vsel %vm1231_vm9, %v1232_v42, %v1233_v43  ;;  %v1238_v49 = vsel %vm1231_vm9, %v1233_v43, %v1232_v42  ;;  %v1243_v50 = vsel %vm1241_vm10, %v1242_v45, %v1239_v44  ;;  %v1246_v51 = vsel %vm1241_vm10, %v1239_v44, %v1242_v45 }
 0x737   : > { %v1251_v52 = vadd.f32 %v1234_v47, %v1227_v40  ;;  %v1252_v53 = vadd.f32 %v1238_v49, %v1228_v41  ;;  %v1253_v54 = vsub.f32 %v1246_v51, %v1227_v40  ;;  %v1254_v56 = vsub.f32 %v1243_v50, %v1228_v41 }
 0x738   : > { %v1336_v40 = vsub.s32 3, %v2178_v24  ;;  %v1331_v41 = vrot.slane %v2183_v26, %v1330_v39  ;;  %v1911_v26 = vld [vmem:[%s2445_s8] sm:$0xff]  }
 0x739   : > { %v1255_v58 = vsel %vm1249_vm11, %v1251_v52, %v1253_v54  ;;  %v1256_v59 = vsel %vm1250_vm12, %v1252_v53, %v1254_v56  ;;  %v1912_v53 = vld [vmem:[%s2445_s8 + $0x8] sm:$0xff]   ;;  %v1913_v54 = vld [vmem:[%s2445_s8 + $0x10] sm:$0xff]   ;;  %v1914_v56 = vld [vmem:[%s2445_s8 + $0x18] sm:$0xff]  }
 0x73a   : > { %v1259_v60 = vrot.slane %v1255_v58, 4  ;;  %v1260_v63 = vrot.slane %v1256_v59, 4  ;;  %v1337_v44 = vrot.slane %v2180_v25, %v1336_v40 }
 0x73c   : > { %v1261_v2 = vsel %vm1002_vm4, %v1259_v60, %v1260_v63  ;;  %v1265_v3 = vsel %vm1002_vm4, %v1260_v63, %v1259_v60  ;;  %v1918_v60 = vld [vmem:[%s2445_s8 + $0x38] sm:$0xff]   ;;  %v1665_v63 = vld [vmem:[%s2444_s7] ss:$0 sm:$0xff] }
 0x73d   : > { %v1270_v5 = vadd.f32 %v1261_v2, %v1255_v58  ;;  %v1271_v6 = vadd.f32 %v1265_v3, %v1256_v59  ;;  %v1272_v7 = vsub.f32 %v1265_v3, %v1255_v58  ;;  %v1273_v8 = vsub.f32 %v1261_v2, %v1256_v59  ;;  %v1916_v58 = vld [vmem:[%s2445_s8 + $0x28] sm:$0xff]   ;;  %v1917_v59 = vld [vmem:[%s2445_s8 + $0x30] sm:$0xff]  }
 0x73f   : > { %v1274_v9 = vsel %vm1268_vm13, %v1270_v5, %v1272_v7  ;;  %v1275_v10 = vsel %vm1269_vm14, %v1271_v6, %v1273_v8 }
 0x740   : > { %v1282_v12 = vsub.f32 %v1274_v9, %v1275_v10  ;;  %v1280_v14 = vadd.f32 %v1275_v10, %v1274_v9 }
 0x742   : > { %v1293_v16 = vadd.f32 %v1664_v11, %v1282_v12  ;;  %v1292_v17 = vadd.f32 %v1664_v11, %v1280_v14 }
 0x744   : > { %v1299_v19 = vmul.f32 %v1297_v13, %v1293_v16  ;;  %v1298_v20 = vmul.f32 %v1297_v13, %v1292_v17 }
 0x746   : > { %v2316_v21 = vadd.f32 %v1299_v19, %v2150_v1  ;;  %v2319_v55 = vadd.f32 %v1298_v20, %v2148_v0 }
 0x748   : > { %v1305_v22 = vsel %vm379_vm0, %v2316_v21, 0.0  ;;  %v1302_v48 = vsel %vm379_vm0, %v2319_v55, 0.0 }
 0x749   : > { %1306 = vadd.xlane.f32.xlu0 %v1305_v22  ;;  %1303 = vadd.xlane.f32.xlu1 %v1302_v48 }
 0x7d6   : > { %v1307_v18 = vpop.xlane.xlu0 %1306  ;;  %v1304_v23 = vpop.xlane.xlu1 %1303 }
 0x7d7   : > { %v1309_v27 = vmul.f32 0.03125, %v1307_v18  ;;  %v1308_v28 = vmul.f32 0.03125, %v1304_v23 }
 0x7d9   : > { %v1311_v61 = vsub.f32 %v2316_v21, %v1309_v27  ;;  %v1310_v1 = vsub.f32 %v2319_v55, %v1308_v28 }
 0x7db   : > { %v1313_v29 = vmul.f32 %v1311_v61, %v1311_v61  ;;  %v1312_v62 = vmul.f32 %v1310_v1, %v1310_v1 }
 0x7dd   : > { %v1317_v0 = vsel %vm379_vm0, %v1313_v29, 0.0  ;;  %v1314_v30 = vsel %vm379_vm0, %v1312_v62, 0.0  ;;  %v1669_v29 = vld [vmem:[%s2446_s9] ss:$0 sm:$0xff] }
 0x7de   : > { %1318 = vadd.xlane.f32.xlu0 %v1317_v0  ;;  %1315 = vadd.xlane.f32.xlu1 %v1314_v30 }
 0x86b   : > { %v1319_v33 = vpop.xlane.xlu0 %1318  ;;  %v1316_v34 = vpop.xlane.xlu1 %1315 }
 0x86c   : > { %v1321_v35 = vmul.f32 0.03125, %v1319_v33  ;;  %v1320_v36 = vmul.f32 0.03125, %v1316_v34 }
 0x86e   : > { %v1323_v37 = vadd.f32 1e-06, %v1321_v35  ;;  %v1322_v38 = vadd.f32 1e-06, %v1320_v36 }
 0x870   : > { %1955 = vrsqrt.f32 %v1323_v37 }
 0x871   : > { %1957 = vrsqrt.f32 %v1322_v38 }
 0x87a   : > { %v1956_v42 = vpop.eup %1955 }
 0x87b   : > { %v1958_v43 = vpop.eup %1957  ;;  %v1327_v45 = vmul.f32 %v1956_v42, %v1311_v61 }
 0x87c   : > { %v1326_v46 = vmul.f32 %v1958_v43, %v1310_v1  ;;  %v1541_v1 = vsub.s32 5, %v2178_v24 }
 0x87d   : > { %v1333_v47 = vmul.f32 %v1331_v41, %v1327_v45 }
 0x87e   : > { %v1332_v49 = vmul.f32 %v1331_v41, %v1326_v46  ;;  %v1542_v62 = vrot.slane %v2180_v25, %v1541_v1 }
 0x87f   : > { %v1339_v50 = vadd.f32 %v1337_v44, %v1333_v47 }
 0x880   : > { %v1338_v51 = vadd.f32 %v1337_v44, %v1332_v49 }
 0x882   : > { %v1340_v52 = vpack.c.bf16 %v1339_v50, %v1338_v51 }
 0x884   : > { %1809 = vmatmul.mubr.msk.bf16.vlgmr.msra.gmra.mrb[16].mxu0 %vm379_vm0, %v1340_v52 }
 0x885   : > { %1828 = vmatprep.mubr.msk.bf16.mxu0 %vm2028_vm1, %v2027_v15  ;;  %1813 = vmatpush3.bf16.msra.mxu0 %v1911_v26 }
 0x886   : > { %1814 = vmatprep.subr.bf16.mxu0 %v2027_v15 }
 0x889   : > { %1815 = vmatpush3.bf16.msra.mxu0 %v1912_v53 }
 0x88a   : > { %1816 = vmatprep.subr.bf16.mxu0 %v2027_v15 }
 0x88d   : > { %1817 = vmatpush3.bf16.msra.mxu0 %v1913_v54 }
 0x88e   : > { %1818 = vmatprep.subr.bf16.mxu0 %v2027_v15 }
 0x891   : > { %1819 = vmatpush3.bf16.msra.mxu0 %v1914_v56 }
 0x892   : > { %1820 = vmatprep.subr.bf16.mxu0 %v2027_v15 }
 0x895   : > { %1821 = vmatpush3.bf16.msra.mxu0 %v1915_v57 }
 0x896   : > { %1822 = vmatprep.subr.bf16.mxu0 %v2027_v15 }
 0x899   : > { %1823 = vmatpush3.bf16.msra.mxu0 %v1916_v58 }
 0x89a   : > { %1824 = vmatprep.subr.bf16.mxu0 %v2027_v15 }
 0x89d   : > { %1825 = vmatpush3.bf16.msra.mxu0 %v1917_v59 }
 0x89e   : > { %1826 = vmatprep.subr.bf16.mxu0 %v2027_v15 }
 0x8a1   : > { %1827 = vmatpush3.bf16.msra.mxu0 %v1918_v60 }
 0x957   : > { %v1401_v2 = vpop.f32.mrb[16].mxu0 }
 0x958   : > { %v1402_v3 = vadd.f32 %v1665_v63, %v1401_v2  ;;  %v1810_v4 = vpop.f32.mrb[17].mxu0 }
 0x959   : > { %v1404_v5 = vpop.f32.mrb[18].mxu0 }
 0x95a   : > { %v1410_v6 = vmul.f32 0.044715, %v1402_v3  ;;  %v1405_v7 = vadd.f32 %v1665_v63, %v1404_v5  ;;  %v1811_v8 = vpop.f32.mrb[19].mxu0  ;;  %v1408_v48 = vmul.f32 0.5, %v1402_v3 }
 0x95c   : > { %v1412_v9 = vmul.f32 %v1410_v6, %v1402_v3  ;;  %v1411_v10 = vmul.f32 0.044715, %v1405_v7  ;;  %v1409_v18 = vmul.f32 0.5, %v1405_v7 }
 0x95e   : > { %v1414_v11 = vmul.f32 %v1412_v9, %v1402_v3  ;;  %v1413_v12 = vmul.f32 %v1411_v10, %v1405_v7 }
 0x960   : > { %v1416_v13 = vadd.f32 %v1414_v11, %v1402_v3  ;;  %v1415_v14 = vmul.f32 %v1413_v12, %v1405_v7 }
 0x962   : > { %v1418_v15 = vmul.f32 0.7978846, %v1416_v13  ;;  %v1417_v16 = vadd.f32 %v1415_v14, %v1405_v7 }
 0x964   : > { %1959 = vtanh.f32 %v1418_v15  ;;  %v1419_v17 = vmul.f32 0.7978846, %v1417_v16 }
 0x966   : > { %1961 = vtanh.f32 %v1419_v17 }
 0x96e   : > { %v1960_v19 = vpop.eup %1959 }
 0x96f   : > { %v1422_v20 = vadd.f32 1.0, %v1960_v19 }
 0x970   : > { %v1962_v22 = vpop.eup %1961 }
 0x971   : > { %v1423_v23 = vadd.f32 1.0, %v1962_v22  ;;  %v1424_v27 = vmul.f32 %v1422_v20, %v1408_v48 }
 0x973   : > { %v1425_v28 = vmul.f32 %v1423_v23, %v1409_v18 }
 0x975   : > { %v1426_v61 = vpack.c.bf16 %v1425_v28, %v1424_v27 }
 0x977   : > { %1829 = vmatmul.mubr.bf16.vlgmr.msra.gmra.mrb[20].mxu0 %v1426_v61 }
 0xa4a   : > { %v1532_v0 = vpop.f32.mrb[20].mxu0 }
 0xa4b   : > { %v1533_v30 = vadd.f32 %v1669_v29, %v1532_v0  ;;  %v1830_v31 = vpop.f32.mrb[21].mxu0 }
 0xa4c   : > { %v1535_v32 = vpop.f32.mrb[22].mxu0 }
 0xa4d   : > { %v1543_v33 = vmul.f32 %v1542_v62, %v1533_v30  ;;  %v1536_v34 = vadd.f32 %v1669_v29, %v1535_v32  ;;  %v1831_v35 = vpop.f32.mrb[23].mxu0 }
 0xa4f   : > { %v1545_v24 = vadd.f32 %v1543_v33, %v2319_v55  ;;  %v1544_v36 = vmul.f32 %v1542_v62, %v1536_v34 }
 0xa51   : > { %1547 = vst.msk [vmem:[%s365_s25] sm:$0xff] %vm379_vm0, %v1545_v24  ;;  %v1546_v25 = vadd.f32 %v1544_v36, %v2316_v21 }
 0xa53   : > { %1548 = vst.msk [vmem:[%s365_s25 + $0x8] sm:$0xff] %vm379_vm0, %v1546_v25 }
 0xa54   : > { %1976 = shalt.err (!%p1973_p3)
}
 0xa55   : > { %s1977_s18 = scalar_lea.hbm %s2389_s11, 256  ;;  %s1981_s29 = scalar_lea.hbm %s2447_s10, 512 }
 0xa56   : > { %p1978_p4 = scmp.ne.s32.totalorder %s2389_s11, %s1977_s18  ;;  %p1982_p9 = scmp.lt.u32.totalorder %s2389_s11, %s2447_s10 }
 0xa57   : > { %p1983_p10 = scmp.lt.u32.totalorder %s1981_s29, %s1977_s18  ;;  %p1985_p12 = scmp.lt.u32.totalorder %s1977_s18, %s2389_s11 }
 0xa58   : > { %p1979_p7 = pnand %p1978_p4, %p2130_p5 }
 0xa59   : > { %p1984_p11 = por %p1983_p10, %p1982_p9 }
 0xa5a   : > { %p1980_p8 = pneg %p1979_p7 }
 0xa5b   : > { %p1986_p13 = por %p1985_p12, %p1984_p11 }
 0xa5d   : > { %p1987_p0 = pnand %p1986_p13, %p1980_p8 }
 0xa5f   : > { %1990 = shalt.err (!%p1987_p0)
}
 0xa60   : > { %s2035_s12 = smov 128   ;;  %s2036_s21 = smov 8  }
 0xa61   : > { %1844 = dma.vmem_to_hbm [thread:$0]  (%p2130_p5), %s2391_s28, 256, %s2389_s11, %s2396_s17, %s2035_s12, %s2035_s12, %s2036_s21  }
 0xa62 PF: > { %p1850_p1 = scmp.ge.s32.totalorder %s2025_s16, 2  ;;  %s1578_s26 = sand.u32 1, %s2013_s13  }
 0xa63   : > { %s1579_s18 = scalar_lea.sflag [#allocation3], %s1578_s26 }
 0xa64   : > { %p1847_p2 = pnand %p1850_p1, %p2134_p6 }
 0xa66   : > { %2008 = dma.done.wait (!%p1847_p2), %s1579_s18, 256  }
 0xa67   : > { %2010 = vsyncadd (!%p1847_p2), %s1579_s18, 4294967040  ;;  %p20_p3 = scmp.ge.s32.totalorder %s2117_s19, 4   ;;  %s2450_s13 = smov %s2017_s14 }
 0xa68   : > { %s2451_s14 = smov %s2021_s15  ;;  %s2452_s15 = smov %s2128_s22 }
 0xa69   : > { %s2453_s16 = smov %s2117_s19  ;;  %22 = sbr.rel (!%p20_p3) target bundleno = 3 (0x3), region = 101 }
 0xa70   :  { %1584 = vsyncpa [#allocation3], 1 }
 0xa71   :  { %1586 = vsyncpa [#allocation3 + $0x1], 1 }

</bundles_post_ra>
